<compile_context>
chip_gen: v6e
topology: v6e:2x2x1
jax: 0.10.0
libtpu: 0.0.40
codegen_flags: <defaults>
</compile_context>

<pallas_src>
import numpy as np
import jax
import jax.numpy as jnp
from jax import lax
from jax.experimental import pallas as pl
from jax.experimental.pallas import tpu as pltpu


# --------------------------- host-side weight prep -------------------------- #

def prepare_params(params):
    """One-time preprocessing of the PyTorch-layout parameters into the matrices the
    fused kernel consumes (Toeplitz conv matrices, lane-padded fc weights)."""
    w1 = np.asarray(params["w1"], np.float32)    # (5,5,1,6)  HWIO
    b1 = np.asarray(params["b1"], np.float32)    # (6,)
    w2 = np.asarray(params["w2"], np.float32)    # (5,5,6,16) HWIO
    b2 = np.asarray(params["b2"], np.float32)    # (16,)
    wf1 = np.asarray(params["wf1"], np.float32)  # (256,120), rows in torch NCHW-flat order
    bf1 = np.asarray(params["bf1"], np.float32)  # (120,)
    wf2 = np.asarray(params["wf2"], np.float32)  # (120,84)
    bf2 = np.asarray(params["bf2"], np.float32)  # (84,)

    # conv1: y1[h, w*6+co] = sum_i (x[i:i+24,:] @ T1[i])[h, w*6+co]
    T1 = np.zeros((5, 28, 24 * 6), np.float32)
    for i in range(5):
        for j in range(5):
            for w in range(24):
                T1[i, w + j, w * 6:(w + 1) * 6] = w1[i, j, 0, :]
    b1row = np.tile(b1, 24)[None, :]                                   # (1,144)

    # pooled conv1 activation lives at lane 12*w' + ci (odd-pixel lanes are garbage,
    # handled by the zero rows below).
    # conv2: y2[h, w*16+co] = sum_i (p1[i:i+8,:] @ T2[i])[h, w*16+co]
    T2 = np.zeros((5, 138, 8 * 16), np.float32)
    for i in range(5):
        for j in range(5):
            for w in range(8):
                for ci in range(6):
                    T2[i, 12 * (w + j) + ci, w * 16:(w + 1) * 16] = w2[i, j, ci, :]
    b2row = np.tile(b2, 8)[None, :]                                    # (1,128)

    # pooled conv2 activation lives at lane 32*wp + co of row hp.
    # fc1 with torch's NCHW flatten (index c*16 + h*4 + w) folded into the weight,
    # output padded 120 -> 128 lanes.
    Wf1 = np.zeros((4, 112, 128), np.float32)
    for hp in range(4):
        for wp in range(4):
            for co in range(16):
                Wf1[hp, 32 * wp + co, :120] = wf1[co * 16 + hp * 4 + wp, :]
    bf1row = np.zeros((1, 128), np.float32)
    bf1row[0, :120] = bf1

    # fc2 padded to a dense 128x128 block, output padded 84 -> 128 lanes.
    Wf2 = np.zeros((128, 128), np.float32)
    Wf2[:120, :84] = wf2
    bf2row = np.zeros((1, 128), np.float32)
    bf2row[0, :84] = bf2

    return dict(T1=jnp.asarray(T1), b1row=jnp.asarray(b1row),
                T2=jnp.asarray(T2), b2row=jnp.asarray(b2row),
                Wf1=jnp.asarray(Wf1), bf1row=jnp.asarray(bf1row),
                Wf2=jnp.asarray(Wf2), bf2row=jnp.asarray(bf2row))


# ------------------------------ fused kernel -------------------------------- #

def lenet_fused_kernel(x_ref, t1_ref, b1_ref, t2_ref, b2_ref,
                       wf1_ref, bf1_ref, wf2_ref, bf2_ref, o_ref):
    f32 = jnp.float32
    x = x_ref[0]                                         # (28, 28) image, all in VMEM

    # ---- conv1 + bias + ReLU : layout (h, w*6+co) = (24, 144) ----
    acc1 = jnp.dot(x[0:24, :], t1_ref[0], preferred_element_type=f32)
    for i in range(1, 5):
        acc1 = acc1 + jnp.dot(x[i:i + 24, :], t1_ref[i], preferred_element_type=f32)
    y1 = jnp.maximum(acc1 + b1_ref[...], 0.0)            # (24, 144)

    # ---- 2x2 max-pool: row-pair max, then 1-pixel lane shift max (even lanes valid) ----
    h1 = jnp.concatenate(
        [jnp.maximum(y1[2 * k:2 * k + 1, :], y1[2 * k + 1:2 * k + 2, :])
         for k in range(12)], axis=0)                    # (12, 144)
    p1 = jnp.maximum(h1[:, 0:138], h1[:, 6:144])         # (12, 138); valid at lane 12*w'+ci

    # ---- conv2 + bias + ReLU : lane-dense layout (h, w*16+co) = (8, 128) ----
    acc2 = jnp.dot(p1[0:8, :], t2_ref[0], preferred_element_type=f32)
    for i in range(1, 5):
        acc2 = acc2 + jnp.dot(p1[i:i + 8, :], t2_ref[i], preferred_element_type=f32)
    y2 = jnp.maximum(acc2 + b2_ref[...], 0.0)            # (8, 128)

    # ---- 2x2 max-pool ----
    h2 = jnp.concatenate(
        [jnp.maximum(y2[2 * k:2 * k + 1, :], y2[2 * k + 1:2 * k + 2, :])
         for k in range(4)], axis=0)                     # (4, 128)
    p2 = jnp.maximum(h2[:, 0:112], h2[:, 16:128])        # (4, 112); valid at lane 32*wp+co

    # ---- fc1 + ReLU (torch NCHW flatten folded into Wf1 on the host) ----
    a1 = bf1_ref[...]
    for hp in range(4):
        a1 = a1 + jnp.dot(p2[hp:hp + 1, :], wf1_ref[hp], preferred_element_type=f32)
    z1 = jnp.maximum(a1, 0.0)                            # (1, 128); lanes >= 120 are 0

    # ---- fc2 + ReLU ----
    z2 = jnp.maximum(jnp.dot(z1, wf2_ref[...], preferred_element_type=f32)
                     + bf2_ref[...], 0.0)                # (1, 128); lanes >= 84 are 0

    # lane/sublane-dense output block; host slices row 0 / first 84 lanes.
    o_ref[0] = jnp.broadcast_to(z2, (8, 128))


# -------------------------------- wrapper ----------------------------------- #

def net_forward(x_nchw, prep):
    N = x_nchw.shape[0]
    x = x_nchw.reshape(N, 28, 28).astype(jnp.float32)    # drop the singleton channel

    zero2 = lambda n: (0, 0)
    zero3 = lambda n: (0, 0, 0)

    out = pl.pallas_call(
        lenet_fused_kernel,
        out_shape=jax.ShapeDtypeStruct((N, 8, 128), jnp.float32),
        grid=(N,),
        in_specs=[
            pl.BlockSpec((1, 28, 28), lambda n: (n, 0, 0)),   # image n
            pl.BlockSpec((5, 28, 144), zero3),                # conv1 Toeplitz
            pl.BlockSpec((1, 144), zero2),                    # conv1 bias row
            pl.BlockSpec((5, 138, 128), zero3),               # conv2 Toeplitz
            pl.BlockSpec((1, 128), zero2),                    # conv2 bias row
            pl.BlockSpec((4, 112, 128), zero3),               # fc1 (flatten folded in)
            pl.BlockSpec((1, 128), zero2),                    # fc1 bias row (padded)
            pl.BlockSpec((128, 128), zero2),                  # fc2 (padded)
            pl.BlockSpec((1, 128), zero2),                    # fc2 bias row (padded)
        ],
        out_specs=pl.BlockSpec((1, 8, 128), lambda n: (n, 0, 0)),
        compiler_params=pltpu.CompilerParams(dimension_semantics=("parallel",)),
    )(x, prep["T1"], prep["b1row"], prep["T2"], prep["b2row"],
      prep["Wf1"], prep["bf1row"], prep["Wf2"], prep["bf2row"])

    return out[:, 0, :84]


net_forward_jit = jax.jit(net_forward)


# --------------------------- pure-JAX reference ------------------------------ #

def ref_forward(x_nchw, params):
    hp = lax.Precision.HIGHEST
    w1 = jnp.transpose(params["w1"], (3, 2, 0, 1))   # HWIO -> OIHW
    y = lax.conv_general_dilated(x_nchw, w1, (1, 1), "VALID",
                                 dimension_numbers=("NCHW", "OIHW", "NCHW"),
                                 precision=hp) + params["b1"][None, :, None, None]
    y = jnp.maximum(y, 0.0)
    y = lax.reduce_window(y, -jnp.inf, lax.max, (1, 1, 2, 2), (1, 1, 2, 2), "VALID")
    w2 = jnp.transpose(params["w2"], (3, 2, 0, 1))
    y = lax.conv_general_dilated(y, w2, (1, 1), "VALID",
                                 dimension_numbers=("NCHW", "OIHW", "NCHW"),
                                 precision=hp) + params["b2"][None, :, None, None]
    y = jnp.maximum(y, 0.0)
    y = lax.reduce_window(y, -jnp.inf, lax.max, (1, 1, 2, 2), (1, 1, 2, 2), "VALID")
    y = y.reshape(y.shape[0], -1)
    y = jnp.maximum(jnp.dot(y, params["wf1"], precision=hp) + params["bf1"], 0.0)
    y = jnp.maximum(jnp.dot(y, params["wf2"], precision=hp) + params["bf2"], 0.0)
    return y


# ---------------------------------- main ------------------------------------ #

if __name__ == "__main__":
    key = jax.random.PRNGKey(0)
    ks = jax.random.split(key, 9)

    # Deterministic synthetic parameters (conv weights HWIO, fc weights as (in, out)).
    params = {
        "w1": 0.1 * jax.random.normal(ks[0], (5, 5, 1, 6), jnp.float32),
        "b1": 0.1 * jax.random.normal(ks[1], (6,), jnp.float32),
        "w2": 0.1 * jax.random.normal(ks[2], (5, 5, 6, 16), jnp.float32),
        "b2": 0.1 * jax.random.normal(ks[3], (16,), jnp.float32),
        "wf1": 0.1 * jax.random.normal(ks[4], (256, 120), jnp.float32),
        "bf1": 0.1 * jax.random.normal(ks[5], (120,), jnp.float32),
        "wf2": 0.1 * jax.random.normal(ks[6], (120, 84), jnp.float32),
        "bf2": 0.1 * jax.random.normal(ks[7], (84,), jnp.float32),
    }

    # Input: batch=2, 1 channel, 28x28 (so the flatten is 16*4*4 = 256 as in the module).
    x = jax.random.normal(ks[8], (2, 1, 28, 28), jnp.float32)

    prep = prepare_params(params)                      # one-time host weight prep
    out = jax.block_until_ready(net_forward_jit(x, prep))
    ref = jax.block_until_ready(ref_forward(x, params))

    assert out.shape == (2, 84), out.shape
    np.testing.assert_allclose(np.asarray(out), np.asarray(ref), rtol=1e-2, atol=1e-2)
    print("KERNEL_OK")
</pallas_src>

<mosaic_0001>
module attributes {stable_mosaic.version = 11 : i64} {
  func.func @lenet_fused_kernel(%arg0: i32, %arg1: memref<1x28x28xf32, #tpu.memory_space<vmem>>, %arg2: memref<5x28x144xf32, #tpu.memory_space<vmem>>, %arg3: memref<1x144xf32, #tpu.memory_space<vmem>>, %arg4: memref<5x138x128xf32, #tpu.memory_space<vmem>>, %arg5: memref<1x128xf32, #tpu.memory_space<vmem>>, %arg6: memref<4x112x128xf32, #tpu.memory_space<vmem>>, %arg7: memref<1x128xf32, #tpu.memory_space<vmem>>, %arg8: memref<128x128xf32, #tpu.memory_space<vmem>>, %arg9: memref<1x128xf32, #tpu.memory_space<vmem>>, %arg10: memref<1x8x128xf32, #tpu.memory_space<vmem>>) attributes {dimension_semantics = [#tpu.dimension_semantics<parallel>], iteration_bounds = array<i64: 2>, scalar_prefetch = 0 : i64, scratch_operands = 0 : i64, tpu.core_type = #tpu.core_type<tc>, window_params = [{transform_indices = @transform_0, window_bounds = array<i64: 1, 28, 28>}, {pipeline_mode = #tpu.pipeline_mode<synchronous>, transform_indices = @transform_1, window_bounds = array<i64: 5, 28, 144>}, {pipeline_mode = #tpu.pipeline_mode<synchronous>, transform_indices = @transform_2, window_bounds = array<i64: 1, 144>}, {pipeline_mode = #tpu.pipeline_mode<synchronous>, transform_indices = @transform_3, window_bounds = array<i64: 5, 138, 128>}, {pipeline_mode = #tpu.pipeline_mode<synchronous>, transform_indices = @transform_4, window_bounds = array<i64: 1, 128>}, {pipeline_mode = #tpu.pipeline_mode<synchronous>, transform_indices = @transform_5, window_bounds = array<i64: 4, 112, 128>}, {pipeline_mode = #tpu.pipeline_mode<synchronous>, transform_indices = @transform_6, window_bounds = array<i64: 1, 128>}, {pipeline_mode = #tpu.pipeline_mode<synchronous>, transform_indices = @transform_7, window_bounds = array<i64: 128, 128>}, {pipeline_mode = #tpu.pipeline_mode<synchronous>, transform_indices = @transform_8, window_bounds = array<i64: 1, 128>}, {transform_indices = @transform_9, window_bounds = array<i64: 1, 8, 128>}]} {
    %c0 = arith.constant 0 : index
    %c0_0 = arith.constant 0 : index
    %c0_1 = arith.constant 0 : index
    %0 = vector.load %arg1[%c0, %c0_0, %c0_1] : memref<1x28x28xf32, #tpu.memory_space<vmem>>, vector<1x28x28xf32>
    %1 = vector.shape_cast %0 : vector<1x28x28xf32> to vector<28x28xf32>
    %2 = vector.extract_strided_slice %1 {offsets = [0, 0], sizes = [24, 28], strides = [1, 1]} : vector<28x28xf32> to vector<24x28xf32>
    %c0_2 = arith.constant 0 : index
    %c0_3 = arith.constant 0 : index
    %c0_4 = arith.constant 0 : index
    %3 = vector.load %arg2[%c0_2, %c0_3, %c0_4] : memref<5x28x144xf32, #tpu.memory_space<vmem>>, vector<1x28x144xf32>
    %4 = vector.shape_cast %3 : vector<1x28x144xf32> to vector<28x144xf32>
    %cst = arith.constant dense<0.000000e+00> : vector<24x144xf32>
    %5 = tpu.matmul %2, %4, %cst {dimension_numbers = #tpu.dot_dimension_numbers<[1], [0], [0], [1], [0, 0, 1, 1], [], []>} : vector<24x28xf32>, vector<28x144xf32>, vector<24x144xf32> -> vector<24x144xf32>
    %6 = vector.extract_strided_slice %1 {offsets = [1, 0], sizes = [24, 28], strides = [1, 1]} : vector<28x28xf32> to vector<24x28xf32>
    %c1 = arith.constant 1 : index
    %c0_5 = arith.constant 0 : index
    %c0_6 = arith.constant 0 : index
    %7 = vector.load %arg2[%c1, %c0_5, %c0_6] : memref<5x28x144xf32, #tpu.memory_space<vmem>>, vector<1x28x144xf32>
    %8 = vector.shape_cast %7 : vector<1x28x144xf32> to vector<28x144xf32>
    %cst_7 = arith.constant dense<0.000000e+00> : vector<24x144xf32>
    %9 = tpu.matmul %6, %8, %cst_7 {dimension_numbers = #tpu.dot_dimension_numbers<[1], [0], [0], [1], [0, 0, 1, 1], [], []>} : vector<24x28xf32>, vector<28x144xf32>, vector<24x144xf32> -> vector<24x144xf32>
    %10 = arith.addf %5, %9 : vector<24x144xf32>
    %11 = vector.extract_strided_slice %1 {offsets = [2, 0], sizes = [24, 28], strides = [1, 1]} : vector<28x28xf32> to vector<24x28xf32>
    %c2 = arith.constant 2 : index
    %c0_8 = arith.constant 0 : index
    %c0_9 = arith.constant 0 : index
    %12 = vector.load %arg2[%c2, %c0_8, %c0_9] : memref<5x28x144xf32, #tpu.memory_space<vmem>>, vector<1x28x144xf32>
    %13 = vector.shape_cast %12 : vector<1x28x144xf32> to vector<28x144xf32>
    %cst_10 = arith.constant dense<0.000000e+00> : vector<24x144xf32>
    %14 = tpu.matmul %11, %13, %cst_10 {dimension_numbers = #tpu.dot_dimension_numbers<[1], [0], [0], [1], [0, 0, 1, 1], [], []>} : vector<24x28xf32>, vector<28x144xf32>, vector<24x144xf32> -> vector<24x144xf32>
    %15 = arith.addf %10, %14 : vector<24x144xf32>
    %16 = vector.extract_strided_slice %1 {offsets = [3, 0], sizes = [24, 28], strides = [1, 1]} : vector<28x28xf32> to vector<24x28xf32>
    %c3 = arith.constant 3 : index
    %c0_11 = arith.constant 0 : index
    %c0_12 = arith.constant 0 : index
    %17 = vector.load %arg2[%c3, %c0_11, %c0_12] : memref<5x28x144xf32, #tpu.memory_space<vmem>>, vector<1x28x144xf32>
    %18 = vector.shape_cast %17 : vector<1x28x144xf32> to vector<28x144xf32>
    %cst_13 = arith.constant dense<0.000000e+00> : vector<24x144xf32>
    %19 = tpu.matmul %16, %18, %cst_13 {dimension_numbers = #tpu.dot_dimension_numbers<[1], [0], [0], [1], [0, 0, 1, 1], [], []>} : vector<24x28xf32>, vector<28x144xf32>, vector<24x144xf32> -> vector<24x144xf32>
    %20 = arith.addf %15, %19 : vector<24x144xf32>
    %21 = vector.extract_strided_slice %1 {offsets = [4, 0], sizes = [24, 28], strides = [1, 1]} : vector<28x28xf32> to vector<24x28xf32>
    %c4 = arith.constant 4 : index
    %c0_14 = arith.constant 0 : index
    %c0_15 = arith.constant 0 : index
    %22 = vector.load %arg2[%c4, %c0_14, %c0_15] : memref<5x28x144xf32, #tpu.memory_space<vmem>>, vector<1x28x144xf32>
    %23 = vector.shape_cast %22 : vector<1x28x144xf32> to vector<28x144xf32>
    %cst_16 = arith.constant dense<0.000000e+00> : vector<24x144xf32>
    %24 = tpu.matmul %21, %23, %cst_16 {dimension_numbers = #tpu.dot_dimension_numbers<[1], [0], [0], [1], [0, 0, 1, 1], [], []>} : vector<24x28xf32>, vector<28x144xf32>, vector<24x144xf32> -> vector<24x144xf32>
    %25 = arith.addf %20, %24 : vector<24x144xf32>
    %c0_17 = arith.constant 0 : index
    %c0_18 = arith.constant 0 : index
    %26 = vector.load %arg3[%c0_17, %c0_18] : memref<1x144xf32, #tpu.memory_space<vmem>>, vector<1x144xf32>
    %27 = vector.broadcast %26 : vector<1x144xf32> to vector<24x144xf32>
    %28 = arith.addf %25, %27 : vector<24x144xf32>
    %cst_19 = arith.constant 0.000000e+00 : f32
    %29 = vector.broadcast %cst_19 : f32 to vector<24x144xf32>
    %30 = arith.maximumf %28, %29 : vector<24x144xf32>
    %31 = vector.extract_strided_slice %30 {offsets = [0, 0], sizes = [1, 144], strides = [1, 1]} : vector<24x144xf32> to vector<1x144xf32>
    %32 = vector.extract_strided_slice %30 {offsets = [1, 0], sizes = [1, 144], strides = [1, 1]} : vector<24x144xf32> to vector<1x144xf32>
    %33 = arith.maximumf %31, %32 : vector<1x144xf32>
    %34 = vector.extract_strided_slice %30 {offsets = [2, 0], sizes = [1, 144], strides = [1, 1]} : vector<24x144xf32> to vector<1x144xf32>
    %35 = vector.extract_strided_slice %30 {offsets = [3, 0], sizes = [1, 144], strides = [1, 1]} : vector<24x144xf32> to vector<1x144xf32>
    %36 = arith.maximumf %34, %35 : vector<1x144xf32>
    %37 = vector.extract_strided_slice %30 {offsets = [4, 0], sizes = [1, 144], strides = [1, 1]} : vector<24x144xf32> to vector<1x144xf32>
    %38 = vector.extract_strided_slice %30 {offsets = [5, 0], sizes = [1, 144], strides = [1, 1]} : vector<24x144xf32> to vector<1x144xf32>
    %39 = arith.maximumf %37, %38 : vector<1x144xf32>
    %40 = vector.extract_strided_slice %30 {offsets = [6, 0], sizes = [1, 144], strides = [1, 1]} : vector<24x144xf32> to vector<1x144xf32>
    %41 = vector.extract_strided_slice %30 {offsets = [7, 0], sizes = [1, 144], strides = [1, 1]} : vector<24x144xf32> to vector<1x144xf32>
    %42 = arith.maximumf %40, %41 : vector<1x144xf32>
    %43 = vector.extract_strided_slice %30 {offsets = [8, 0], sizes = [1, 144], strides = [1, 1]} : vector<24x144xf32> to vector<1x144xf32>
    %44 = vector.extract_strided_slice %30 {offsets = [9, 0], sizes = [1, 144], strides = [1, 1]} : vector<24x144xf32> to vector<1x144xf32>
    %45 = arith.maximumf %43, %44 : vector<1x144xf32>
    %46 = vector.extract_strided_slice %30 {offsets = [10, 0], sizes = [1, 144], strides = [1, 1]} : vector<24x144xf32> to vector<1x144xf32>
    %47 = vector.extract_strided_slice %30 {offsets = [11, 0], sizes = [1, 144], strides = [1, 1]} : vector<24x144xf32> to vector<1x144xf32>
    %48 = arith.maximumf %46, %47 : vector<1x144xf32>
    %49 = vector.extract_strided_slice %30 {offsets = [12, 0], sizes = [1, 144], strides = [1, 1]} : vector<24x144xf32> to vector<1x144xf32>
    %50 = vector.extract_strided_slice %30 {offsets = [13, 0], sizes = [1, 144], strides = [1, 1]} : vector<24x144xf32> to vector<1x144xf32>
    %51 = arith.maximumf %49, %50 : vector<1x144xf32>
    %52 = vector.extract_strided_slice %30 {offsets = [14, 0], sizes = [1, 144], strides = [1, 1]} : vector<24x144xf32> to vector<1x144xf32>
    %53 = vector.extract_strided_slice %30 {offsets = [15, 0], sizes = [1, 144], strides = [1, 1]} : vector<24x144xf32> to vector<1x144xf32>
    %54 = arith.maximumf %52, %53 : vector<1x144xf32>
    %55 = vector.extract_strided_slice %30 {offsets = [16, 0], sizes = [1, 144], strides = [1, 1]} : vector<24x144xf32> to vector<1x144xf32>
    %56 = vector.extract_strided_slice %30 {offsets = [17, 0], sizes = [1, 144], strides = [1, 1]} : vector<24x144xf32> to vector<1x144xf32>
    %57 = arith.maximumf %55, %56 : vector<1x144xf32>
    %58 = vector.extract_strided_slice %30 {offsets = [18, 0], sizes = [1, 144], strides = [1, 1]} : vector<24x144xf32> to vector<1x144xf32>
    %59 = vector.extract_strided_slice %30 {offsets = [19, 0], sizes = [1, 144], strides = [1, 1]} : vector<24x144xf32> to vector<1x144xf32>
    %60 = arith.maximumf %58, %59 : vector<1x144xf32>
    %61 = vector.extract_strided_slice %30 {offsets = [20, 0], sizes = [1, 144], strides = [1, 1]} : vector<24x144xf32> to vector<1x144xf32>
    %62 = vector.extract_strided_slice %30 {offsets = [21, 0], sizes = [1, 144], strides = [1, 1]} : vector<24x144xf32> to vector<1x144xf32>
    %63 = arith.maximumf %61, %62 : vector<1x144xf32>
    %64 = vector.extract_strided_slice %30 {offsets = [22, 0], sizes = [1, 144], strides = [1, 1]} : vector<24x144xf32> to vector<1x144xf32>
    %65 = vector.extract_strided_slice %30 {offsets = [23, 0], sizes = [1, 144], strides = [1, 1]} : vector<24x144xf32> to vector<1x144xf32>
    %66 = arith.maximumf %64, %65 : vector<1x144xf32>
    %67 = tpu.concatenate %33, %36, %39, %42, %45, %48, %51, %54, %57, %60, %63, %66 in 0 : vector<1x144xf32>, vector<1x144xf32>, vector<1x144xf32>, vector<1x144xf32>, vector<1x144xf32>, vector<1x144xf32>, vector<1x144xf32>, vector<1x144xf32>, vector<1x144xf32>, vector<1x144xf32>, vector<1x144xf32>, vector<1x144xf32> -> vector<12x144xf32>
    %68 = vector.extract_strided_slice %67 {offsets = [0, 0], sizes = [12, 138], strides = [1, 1]} : vector<12x144xf32> to vector<12x138xf32>
    %69 = vector.extract_strided_slice %67 {offsets = [0, 6], sizes = [12, 138], strides = [1, 1]} : vector<12x144xf32> to vector<12x138xf32>
    %70 = arith.maximumf %68, %69 : vector<12x138xf32>
    %71 = vector.extract_strided_slice %70 {offsets = [0, 0], sizes = [8, 138], strides = [1, 1]} : vector<12x138xf32> to vector<8x138xf32>
    %c0_20 = arith.constant 0 : index
    %c0_21 = arith.constant 0 : index
    %c0_22 = arith.constant 0 : index
    %72 = vector.load %arg4[%c0_20, %c0_21, %c0_22] : memref<5x138x128xf32, #tpu.memory_space<vmem>>, vector<1x138x128xf32>
    %73 = vector.shape_cast %72 : vector<1x138x128xf32> to vector<138x128xf32>
    %cst_23 = arith.constant dense<0.000000e+00> : vector<8x128xf32>
    %74 = tpu.matmul %71, %73, %cst_23 {dimension_numbers = #tpu.dot_dimension_numbers<[1], [0], [0], [1], [0, 0, 1, 1], [], []>} : vector<8x138xf32>, vector<138x128xf32>, vector<8x128xf32> -> vector<8x128xf32>
    %75 = vector.extract_strided_slice %70 {offsets = [1, 0], sizes = [8, 138], strides = [1, 1]} : vector<12x138xf32> to vector<8x138xf32>
    %c1_24 = arith.constant 1 : index
    %c0_25 = arith.constant 0 : index
    %c0_26 = arith.constant 0 : index
    %76 = vector.load %arg4[%c1_24, %c0_25, %c0_26] : memref<5x138x128xf32, #tpu.memory_space<vmem>>, vector<1x138x128xf32>
    %77 = vector.shape_cast %76 : vector<1x138x128xf32> to vector<138x128xf32>
    %cst_27 = arith.constant dense<0.000000e+00> : vector<8x128xf32>
    %78 = tpu.matmul %75, %77, %cst_27 {dimension_numbers = #tpu.dot_dimension_numbers<[1], [0], [0], [1], [0, 0, 1, 1], [], []>} : vector<8x138xf32>, vector<138x128xf32>, vector<8x128xf32> -> vector<8x128xf32>
    %79 = arith.addf %74, %78 : vector<8x128xf32>
    %80 = vector.extract_strided_slice %70 {offsets = [2, 0], sizes = [8, 138], strides = [1, 1]} : vector<12x138xf32> to vector<8x138xf32>
    %c2_28 = arith.constant 2 : index
    %c0_29 = arith.constant 0 : index
    %c0_30 = arith.constant 0 : index
    %81 = vector.load %arg4[%c2_28, %c0_29, %c0_30] : memref<5x138x128xf32, #tpu.memory_space<vmem>>, vector<1x138x128xf32>
    %82 = vector.shape_cast %81 : vector<1x138x128xf32> to vector<138x128xf32>
    %cst_31 = arith.constant dense<0.000000e+00> : vector<8x128xf32>
    %83 = tpu.matmul %80, %82, %cst_31 {dimension_numbers = #tpu.dot_dimension_numbers<[1], [0], [0], [1], [0, 0, 1, 1], [], []>} : vector<8x138xf32>, vector<138x128xf32>, vector<8x128xf32> -> vector<8x128xf32>
    %84 = arith.addf %79, %83 : vector<8x128xf32>
    %85 = vector.extract_strided_slice %70 {offsets = [3, 0], sizes = [8, 138], strides = [1, 1]} : vector<12x138xf32> to vector<8x138xf32>
    %c3_32 = arith.constant 3 : index
    %c0_33 = arith.constant 0 : index
    %c0_34 = arith.constant 0 : index
    %86 = vector.load %arg4[%c3_32, %c0_33, %c0_34] : memref<5x138x128xf32, #tpu.memory_space<vmem>>, vector<1x138x128xf32>
    %87 = vector.shape_cast %86 : vector<1x138x128xf32> to vector<138x128xf32>
    %cst_35 = arith.constant dense<0.000000e+00> : vector<8x128xf32>
    %88 = tpu.matmul %85, %87, %cst_35 {dimension_numbers = #tpu.dot_dimension_numbers<[1], [0], [0], [1], [0, 0, 1, 1], [], []>} : vector<8x138xf32>, vector<138x128xf32>, vector<8x128xf32> -> vector<8x128xf32>
    %89 = arith.addf %84, %88 : vector<8x128xf32>
    %90 = vector.extract_strided_slice %70 {offsets = [4, 0], sizes = [8, 138], strides = [1, 1]} : vector<12x138xf32> to vector<8x138xf32>
    %c4_36 = arith.constant 4 : index
    %c0_37 = arith.constant 0 : index
    %c0_38 = arith.constant 0 : index
    %91 = vector.load %arg4[%c4_36, %c0_37, %c0_38] : memref<5x138x128xf32, #tpu.memory_space<vmem>>, vector<1x138x128xf32>
    %92 = vector.shape_cast %91 : vector<1x138x128xf32> to vector<138x128xf32>
    %cst_39 = arith.constant dense<0.000000e+00> : vector<8x128xf32>
    %93 = tpu.matmul %90, %92, %cst_39 {dimension_numbers = #tpu.dot_dimension_numbers<[1], [0], [0], [1], [0, 0, 1, 1], [], []>} : vector<8x138xf32>, vector<138x128xf32>, vector<8x128xf32> -> vector<8x128xf32>
    %94 = arith.addf %89, %93 : vector<8x128xf32>
    %c0_40 = arith.constant 0 : index
    %c0_41 = arith.constant 0 : index
    %95 = vector.load %arg5[%c0_40, %c0_41] : memref<1x128xf32, #tpu.memory_space<vmem>>, vector<1x128xf32>
    %96 = vector.broadcast %95 : vector<1x128xf32> to vector<8x128xf32>
    %97 = arith.addf %94, %96 : vector<8x128xf32>
    %cst_42 = arith.constant 0.000000e+00 : f32
    %98 = vector.broadcast %cst_42 : f32 to vector<8x128xf32>
    %99 = arith.maximumf %97, %98 : vector<8x128xf32>
    %100 = vector.extract_strided_slice %99 {offsets = [0, 0], sizes = [1, 128], strides = [1, 1]} : vector<8x128xf32> to vector<1x128xf32>
    %101 = vector.extract_strided_slice %99 {offsets = [1, 0], sizes = [1, 128], strides = [1, 1]} : vector<8x128xf32> to vector<1x128xf32>
    %102 = arith.maximumf %100, %101 : vector<1x128xf32>
    %103 = vector.extract_strided_slice %99 {offsets = [2, 0], sizes = [1, 128], strides = [1, 1]} : vector<8x128xf32> to vector<1x128xf32>
    %104 = vector.extract_strided_slice %99 {offsets = [3, 0], sizes = [1, 128], strides = [1, 1]} : vector<8x128xf32> to vector<1x128xf32>
    %105 = arith.maximumf %103, %104 : vector<1x128xf32>
    %106 = vector.extract_strided_slice %99 {offsets = [4, 0], sizes = [1, 128], strides = [1, 1]} : vector<8x128xf32> to vector<1x128xf32>
    %107 = vector.extract_strided_slice %99 {offsets = [5, 0], sizes = [1, 128], strides = [1, 1]} : vector<8x128xf32> to vector<1x128xf32>
    %108 = arith.maximumf %106, %107 : vector<1x128xf32>
    %109 = vector.extract_strided_slice %99 {offsets = [6, 0], sizes = [1, 128], strides = [1, 1]} : vector<8x128xf32> to vector<1x128xf32>
    %110 = vector.extract_strided_slice %99 {offsets = [7, 0], sizes = [1, 128], strides = [1, 1]} : vector<8x128xf32> to vector<1x128xf32>
    %111 = arith.maximumf %109, %110 : vector<1x128xf32>
    %112 = tpu.concatenate %102, %105, %108, %111 in 0 : vector<1x128xf32>, vector<1x128xf32>, vector<1x128xf32>, vector<1x128xf32> -> vector<4x128xf32>
    %113 = vector.extract_strided_slice %112 {offsets = [0, 0], sizes = [4, 112], strides = [1, 1]} : vector<4x128xf32> to vector<4x112xf32>
    %114 = vector.extract_strided_slice %112 {offsets = [0, 16], sizes = [4, 112], strides = [1, 1]} : vector<4x128xf32> to vector<4x112xf32>
    %115 = arith.maximumf %113, %114 : vector<4x112xf32>
    %c0_43 = arith.constant 0 : index
    %c0_44 = arith.constant 0 : index
    %116 = vector.load %arg7[%c0_43, %c0_44] : memref<1x128xf32, #tpu.memory_space<vmem>>, vector<1x128xf32>
    %117 = vector.extract_strided_slice %115 {offsets = [0, 0], sizes = [1, 112], strides = [1, 1]} : vector<4x112xf32> to vector<1x112xf32>
    %c0_45 = arith.constant 0 : index
    %c0_46 = arith.constant 0 : index
    %c0_47 = arith.constant 0 : index
    %118 = vector.load %arg6[%c0_45, %c0_46, %c0_47] : memref<4x112x128xf32, #tpu.memory_space<vmem>>, vector<1x112x128xf32>
    %119 = vector.shape_cast %118 : vector<1x112x128xf32> to vector<112x128xf32>
    %cst_48 = arith.constant dense<0.000000e+00> : vector<1x128xf32>
    %120 = tpu.matmul %117, %119, %cst_48 {dimension_numbers = #tpu.dot_dimension_numbers<[1], [0], [0], [1], [0, 0, 1, 1], [], []>} : vector<1x112xf32>, vector<112x128xf32>, vector<1x128xf32> -> vector<1x128xf32>
    %121 = arith.addf %116, %120 : vector<1x128xf32>
    %122 = vector.extract_strided_slice %115 {offsets = [1, 0], sizes = [1, 112], strides = [1, 1]} : vector<4x112xf32> to vector<1x112xf32>
    %c1_49 = arith.constant 1 : index
    %c0_50 = arith.constant 0 : index
    %c0_51 = arith.constant 0 : index
    %123 = vector.load %arg6[%c1_49, %c0_50, %c0_51] : memref<4x112x128xf32, #tpu.memory_space<vmem>>, vector<1x112x128xf32>
    %124 = vector.shape_cast %123 : vector<1x112x128xf32> to vector<112x128xf32>
    %cst_52 = arith.constant dense<0.000000e+00> : vector<1x128xf32>
    %125 = tpu.matmul %122, %124, %cst_52 {dimension_numbers = #tpu.dot_dimension_numbers<[1], [0], [0], [1], [0, 0, 1, 1], [], []>} : vector<1x112xf32>, vector<112x128xf32>, vector<1x128xf32> -> vector<1x128xf32>
    %126 = arith.addf %121, %125 : vector<1x128xf32>
    %127 = vector.extract_strided_slice %115 {offsets = [2, 0], sizes = [1, 112], strides = [1, 1]} : vector<4x112xf32> to vector<1x112xf32>
    %c2_53 = arith.constant 2 : index
    %c0_54 = arith.constant 0 : index
    %c0_55 = arith.constant 0 : index
    %128 = vector.load %arg6[%c2_53, %c0_54, %c0_55] : memref<4x112x128xf32, #tpu.memory_space<vmem>>, vector<1x112x128xf32>
    %129 = vector.shape_cast %128 : vector<1x112x128xf32> to vector<112x128xf32>
    %cst_56 = arith.constant dense<0.000000e+00> : vector<1x128xf32>
    %130 = tpu.matmul %127, %129, %cst_56 {dimension_numbers = #tpu.dot_dimension_numbers<[1], [0], [0], [1], [0, 0, 1, 1], [], []>} : vector<1x112xf32>, vector<112x128xf32>, vector<1x128xf32> -> vector<1x128xf32>
    %131 = arith.addf %126, %130 : vector<1x128xf32>
    %132 = vector.extract_strided_slice %115 {offsets = [3, 0], sizes = [1, 112], strides = [1, 1]} : vector<4x112xf32> to vector<1x112xf32>
    %c3_57 = arith.constant 3 : index
    %c0_58 = arith.constant 0 : index
    %c0_59 = arith.constant 0 : index
    %133 = vector.load %arg6[%c3_57, %c0_58, %c0_59] : memref<4x112x128xf32, #tpu.memory_space<vmem>>, vector<1x112x128xf32>
    %134 = vector.shape_cast %133 : vector<1x112x128xf32> to vector<112x128xf32>
    %cst_60 = arith.constant dense<0.000000e+00> : vector<1x128xf32>
    %135 = tpu.matmul %132, %134, %cst_60 {dimension_numbers = #tpu.dot_dimension_numbers<[1], [0], [0], [1], [0, 0, 1, 1], [], []>} : vector<1x112xf32>, vector<112x128xf32>, vector<1x128xf32> -> vector<1x128xf32>
    %136 = arith.addf %131, %135 : vector<1x128xf32>
    %cst_61 = arith.constant 0.000000e+00 : f32
    %137 = vector.broadcast %cst_61 : f32 to vector<1x128xf32>
    %138 = arith.maximumf %136, %137 : vector<1x128xf32>
    %c0_62 = arith.constant 0 : index
    %c0_63 = arith.constant 0 : index
    %139 = vector.load %arg8[%c0_62, %c0_63] : memref<128x128xf32, #tpu.memory_space<vmem>>, vector<128x128xf32>
    %cst_64 = arith.constant dense<0.000000e+00> : vector<1x128xf32>
    %140 = tpu.matmul %138, %139, %cst_64 {dimension_numbers = #tpu.dot_dimension_numbers<[1], [0], [0], [1], [0, 0, 1, 1], [], []>} : vector<1x128xf32>, vector<128x128xf32>, vector<1x128xf32> -> vector<1x128xf32>
    %c0_65 = arith.constant 0 : index
    %c0_66 = arith.constant 0 : index
    %141 = vector.load %arg9[%c0_65, %c0_66] : memref<1x128xf32, #tpu.memory_space<vmem>>, vector<1x128xf32>
    %142 = arith.addf %140, %141 : vector<1x128xf32>
    %cst_67 = arith.constant 0.000000e+00 : f32
    %143 = vector.broadcast %cst_67 : f32 to vector<1x128xf32>
    %144 = arith.maximumf %142, %143 : vector<1x128xf32>
    %145 = vector.shape_cast %144 : vector<1x128xf32> to vector<1x128xf32>
    %146 = vector.broadcast %145 : vector<1x128xf32> to vector<8x128xf32>
    %c0_68 = arith.constant 0 : index
    %c0_69 = arith.constant 0 : index
    %c0_70 = arith.constant 0 : index
    %147 = vector.load %arg10[%c0_68, %c0_69, %c0_70] : memref<1x8x128xf32, #tpu.memory_space<vmem>>, vector<1x8x128xf32>
    %148 = vector.shape_cast %147 : vector<1x8x128xf32> to vector<8x128xf32>
    %149 = vector.shape_cast %146 : vector<8x128xf32> to vector<1x8x128xf32>
    tpu.vector_store %arg10[%c0_68, %c0_69, %c0_70], %149 {strides = array<i32>} : memref<1x8x128xf32, #tpu.memory_space<vmem>>, vector<1x8x128xf32>,
    return
  }
  func.func @transform_0(%arg0: i32) -> (i32, i32, i32) {
    %c0_i32 = arith.constant 0 : i32
    %c0_i32_0 = arith.constant 0 : i32
    %c0_i32_1 = arith.constant 0 : i32
    return %arg0, %c0_i32, %c0_i32_0 : i32, i32, i32
  }
  func.func @transform_1(%arg0: i32) -> (i32, i32, i32) {
    %c0_i32 = arith.constant 0 : i32
    %c0_i32_0 = arith.constant 0 : i32
    %c0_i32_1 = arith.constant 0 : i32
    %c0_i32_2 = arith.constant 0 : i32
    return %c0_i32, %c0_i32_0, %c0_i32_1 : i32, i32, i32
  }
  func.func @transform_2(%arg0: i32) -> (i32, i32) {
    %c0_i32 = arith.constant 0 : i32
    %c0_i32_0 = arith.constant 0 : i32
    %c0_i32_1 = arith.constant 0 : i32
    return %c0_i32, %c0_i32_0 : i32, i32
  }
  func.func @transform_3(%arg0: i32) -> (i32, i32, i32) {
    %c0_i32 = arith.constant 0 : i32
    %c0_i32_0 = arith.constant 0 : i32
    %c0_i32_1 = arith.constant 0 : i32
    %c0_i32_2 = arith.constant 0 : i32
    return %c0_i32, %c0_i32_0, %c0_i32_1 : i32, i32, i32
  }
  func.func @transform_4(%arg0: i32) -> (i32, i32) {
    %c0_i32 = arith.constant 0 : i32
    %c0_i32_0 = arith.constant 0 : i32
    %c0_i32_1 = arith.constant 0 : i32
    return %c0_i32, %c0_i32_0 : i32, i32
  }
  func.func @transform_5(%arg0: i32) -> (i32, i32, i32) {
    %c0_i32 = arith.constant 0 : i32
    %c0_i32_0 = arith.constant 0 : i32
    %c0_i32_1 = arith.constant 0 : i32
    %c0_i32_2 = arith.constant 0 : i32
    return %c0_i32, %c0_i32_0, %c0_i32_1 : i32, i32, i32
  }
  func.func @transform_6(%arg0: i32) -> (i32, i32) {
    %c0_i32 = arith.constant 0 : i32
    %c0_i32_0 = arith.constant 0 : i32
    %c0_i32_1 = arith.constant 0 : i32
    return %c0_i32, %c0_i32_0 : i32, i32
  }
  func.func @transform_7(%arg0: i32) -> (i32, i32) {
    %c0_i32 = arith.constant 0 : i32
    %c0_i32_0 = arith.constant 0 : i32
    %c0_i32_1 = arith.constant 0 : i32
    return %c0_i32, %c0_i32_0 : i32, i32
  }
  func.func @transform_8(%arg0: i32) -> (i32, i32) {
    %c0_i32 = arith.constant 0 : i32
    %c0_i32_0 = arith.constant 0 : i32
    %c0_i32_1 = arith.constant 0 : i32
    return %c0_i32, %c0_i32_0 : i32, i32
  }
  func.func @transform_9(%arg0: i32) -> (i32, i32, i32) {
    %c0_i32 = arith.constant 0 : i32
    %c0_i32_0 = arith.constant 0 : i32
    %c0_i32_1 = arith.constant 0 : i32
    return %arg0, %c0_i32, %c0_i32_0 : i32, i32, i32
  }
}

</mosaic_0001>

<bundles_post_ra>
// kernel: net_forward.1
= control target key start
LH: loop header
LB: loop body
LE: loop exit
PB: predicated region body
PF: predicated region fallthrough
CT: control target
= control target key end

     0   :  { %14 = vsyncpa [#allocation3], 0  ;;  %s3156_s0 = inlined_call_operand.vmem [shape: f32[2,28,28], index: 0, kind: input, shape index: {}]   ;;  %s3157_s1 = inlined_call_operand.hbm [shape: f32[5,28,144], index: 1, kind: input, shape index: {}]   ;;  %s3158_s2 = inlined_call_operand.vmem [shape: f32[1,144], index: 2, kind: input, shape index: {}]   ;;  %s3159_s3 = inlined_call_operand.hbm [shape: f32[5,138,128], index: 3, kind: input, shape index: {}]   ;;  %s3160_s4 = inlined_call_operand.vmem [shape: f32[1,128], index: 4, kind: input, shape index: {}]   ;;  %s3161_s5 = inlined_call_operand.hbm [shape: f32[4,112,128], index: 5, kind: input, shape index: {}]   ;;  %s3162_s6 = inlined_call_operand.vmem [shape: f32[1,128], index: 6, kind: input, shape index: {}]   ;;  %s3163_s7 = inlined_call_operand.vmem [shape: f32[128,128], index: 7, kind: input, shape index: {}]   ;;  %s3164_s8 = inlined_call_operand.vmem [shape: f32[1,128], index: 8, kind: input, shape index: {}]   ;;  %s3165_s9 = inlined_call_operand.vmem [shape: f32[2,8,128], index: 9, kind: output, shape index: {}]  }
   0x1   :  { %15 = vsyncpa [#allocation5], 0  ;;  %s2661_s30 = smov 0  }
   0x2 LB: > { %s2600_s10 = smov [#allocation4]   ;;  %s2667_s12 = sadd.s32 4294967295, %s2598_s30   ;;  %s2598_s30 = sphi %s2661_s30, %s21_s30  }
   0x3   : > { %s274_s11 = sshll.u32 %s2600_s10, 4  ;;  %p2163_p0 = scmp.ge.s32.totalorder %s2598_s30, 1  ;;  %s275_s11 = int_to_ptr.vmem [resolvable:$true] %s274_s11 }
   0x4   : > { %p246_p1 = scmp.lt.s32.totalorder %s2598_s30, 3  ;;  %p2476_p2 = scmp.eq.s32.totalorder %s2667_s12, 0 }
   0x5   : > { %s2601_s14 = smov [#allocation2]   ;;  %s2602_s17 = smov [#allocation6]  }
   0x6   : > { %p2672_p3 = pnand %p2163_p0, %p246_p1  ;;  %s258_s15 = sshll.u32 %s2601_s14, 4  ;;  %s2678_s15 = int_to_ptr.vmem [resolvable:$true] %s258_s15 }
   0x7   : > { %s2686_s18 = sshll.u32 %s2602_s17, 4  ;;  %s2517_s19 = scalar_lea.vmem %s275_s11, 11520  ;;  %s291_s18 = int_to_ptr.vmem [resolvable:$true] %s2686_s18 }
   0x8   : > { %p2466_p4 = pneg %p2672_p3  ;;  %p2518_p7 = scmp.ne.s32.totalorder %s275_s11, %s2517_s19 }
   0x9   : > { %p2525_p10 = scmp.lt.s32.totalorder %s275_s11, %s275_s11  ;;  %p2526_p11 = scmp.lt.s32.totalorder %s2517_s19, %s2517_s19 }
   0xa   : > { %p2682_p5 = pnand %p2476_p2, %p2466_p4 }
   0xb   : > { %p2527_p12 = por %p2526_p11, %p2525_p10 }
   0xc   : > { %p2508_p6 = pneg %p2682_p5 }
   0xe   : > { %p2520_p8 = pnand %p2518_p7, %p2508_p6 }
  0x10   : > { %p2521_p9 = pneg %p2520_p8 }
  0x12   : > { %p2528_p13 = pnand %p2527_p12, %p2521_p9 }
  0x14   : > { %2531 = shalt.err (!%p2528_p13)
}
  0x15   : > { %s2603_s20 = smov 128   ;;  %s2604_s21 = smov 8  }
  0x16   : > { %2472 = dma.hbm_to_vmem [thread:$0]  (!%p2682_p5), %s3159_s3, 11520, %s275_s11, [#allocation5], %s2603_s20, %s2603_s20, %s2604_s21  }
  0x17   : > { %s2543_s24 = scalar_lea.vmem %s2678_s15, 5120  ;;  %p2551_p7 = scmp.lt.s32.totalorder %s2678_s15, %s2678_s15 }
  0x18   : > { %p2544_p0 = scmp.ne.s32.totalorder %s2678_s15, %s2543_s24  ;;  %p2552_p8 = scmp.lt.s32.totalorder %s2543_s24, %s2543_s24 }
  0x1a   : > { %p2546_p1 = pnand %p2544_p0, %p2508_p6  ;;  %p2553_p9 = por %p2552_p8, %p2551_p7 }
  0x1c   : > { %p2547_p4 = pneg %p2546_p1 }
  0x1e   : > { %p2554_p10 = pnand %p2553_p9, %p2547_p4 }
  0x20   : > { %2557 = shalt.err (!%p2554_p10)
}
  0x21   : > { %s2605_s25 = smov 256   ;;  %s2606_s26 = smov 16  }
  0x22   : > { %2469 = dma.hbm_to_vmem [thread:$0]  (!%p2682_p5), %s3157_s1, 5120, %s2678_s15, [#allocation3], %s2605_s25, %s2605_s25, %s2606_s26  }
  0x23   : > { %s2569_s29 = scalar_lea.vmem %s291_s18, 7168  ;;  %p2577_p0 = scmp.lt.s32.totalorder %s291_s18, %s291_s18 }
  0x24   : > { %p2570_p11 = scmp.ne.s32.totalorder %s291_s18, %s2569_s29  ;;  %p2578_p1 = scmp.lt.s32.totalorder %s2569_s29, %s2569_s29 }
  0x26   : > { %p2572_p12 = pnand %p2570_p11, %p2508_p6  ;;  %p2579_p4 = por %p2578_p1, %p2577_p0 }
  0x28   : > { %p2573_p13 = pneg %p2572_p12 }
  0x2a   : > { %p2580_p7 = pnand %p2579_p4, %p2573_p13 }
  0x2c   : > { %2583 = shalt.err (!%p2580_p7)
}
  0x2d   : > { %2475 = dma.hbm_to_vmem [thread:$0]  (!%p2682_p5), %s3161_s5, 7168, %s291_s18, [#allocation5], %s2603_s20, %s2603_s20, %s2604_s21  }
  0x2e   : > { %323 = sbr.rel (%p2672_p3) target bundleno = 1258 (0x4ea), region = 56 }
  0x33   : > { %2589 = dma.done.wait (%p2476_p2), [#allocation3], 5120  }
  0x34   : > { %2591 = vsyncadd (%p2476_p2), [#allocation3], 4294962176 }
  0x35   : > { %2593 = dma.done.wait (%p2476_p2), [#allocation5], 18688  }
  0x36   : > { %2595 = vsyncadd (%p2476_p2), [#allocation5], 4294948608  ;;  %p366_p6 = scmp.lt.s32.totalorder %s2667_s12, 1  ;;  %v2607_v0 = vmov 0.0   ;;  %vm415_vm0 = vcmask 1043456   ;;  %v393_v5 = vld [vmem:[#allocation2 + $0x68] sm:$0xff] }
  0x37   : > { %486 = vmatprep.mubr.f32.mxu0 %v2607_v0  ;;  %581 = vmatprep.mubr.f32.mxu1 %v2607_v0  ;;  %v395_v1 = vld [vmem:[#allocation2 + $0x78] sm:$0xf]  ;;  %v394_v3 = vld [vmem:[#allocation2 + $0x70] sm:$0xf]  ;;  %v384_v6 = vld [vmem:[#allocation2 + $0x28] sm:$0xff]  ;;  %vm400_vm1 = vcmask 1046528  }
  0x38   : > { %s3169_s12 = smov (!%p366_p6, %s2667_s12), 1  ;;  %v386_v2 = vld [vmem:[#allocation2 + $0x38] sm:$0xf]  ;;  %2175 = vmatprep.subr.msk.mxu0 %vm415_vm0, %v395_v1  ;;  %v385_v4 = vld [vmem:[#allocation2 + $0x30] sm:$0xf]  ;;  %v392_v7 = vld [vmem:[#allocation2 + $0x60] sm:$0xff] }
  0x39   : > { %s2217_s13 = sshll.u32 %s3169_s12, 5  ;;  %2180 = vmatprep.subr.msk.mxu1 %vm415_vm0, %v386_v2  ;;  %2176 = vmatpush1.msk.msra.mxu0 %vm415_vm0, %v394_v3  ;;  %v383_v8 = vld [vmem:[#allocation2 + $0x20] sm:$0xff]  ;;  %v391_v9 = vld [vmem:[#allocation2 + $0x58] sm:$0xff]  ;;  %v390_v11 = vld [vmem:[#allocation2 + $0x50] sm:$0xff]  ;;  %vm408_vm2 = vcmask 228352   ;;  %vm609_vm3 = vcmask 1045504  }
  0x3a   : > { %2181 = vmatpush1.msk.msra.mxu1 %vm415_vm0, %v385_v4  ;;  %s2744_s16 = scalar_lea.vmem %s3156_s0, %s2217_s13  ;;  %448 = vmatprep.subr.mxu0 %v393_v5  ;;  %v382_v10 = vld [vmem:[#allocation2 + $0x18] sm:$0xff]  ;;  %v381_v12 = vld [vmem:[#allocation2 + $0x10] sm:$0xff]  ;;  %v389_v13 = vld [vmem:[#allocation2 + $0x48] sm:$0xff]  ;;  %vm727_vm4 = vcmask 1044480   ;;  %vm1047_vm5 = vcmask 1040384   ;;  %vm1050_vm6 = vcmask 1041408  }
  0x3b   : > { %543 = vmatprep.subr.mxu1 %v384_v6  ;;  %449 = vmatpush1.msra.mxu0 %v392_v7  ;;  %v380_v14 = vld [vmem:[#allocation2 + $0x8] sm:$0xff]  ;;  %v388_v15 = vld [vmem:[#allocation2 + $0x40] sm:$0xff]  ;;  %v608_v21 = vld [vmem:[#allocation2 + $0xb8] sm:$0xf]  ;;  %vm1053_vm7 = vcmask 1042432   ;;  %s2608_s19 = smov 122  }
  0x3c   : > { %544 = vmatpush1.msra.mxu1 %v383_v8  ;;  %450 = vmatprep.subr.mxu0 %v391_v9  ;;  %v379_v16 = vld [vmem:[#allocation2] sm:$0xff]  ;;  %v2750_v18 = vld [vmem:[%s2744_s16 + $0x8] sm:$0xff]  ;;  %v2755_v22 = vld [vmem:[%s2744_s16 + $0x10] sm:$0xff]  ;;  %vm1082_vm8 = vcmask 998400   ;;  %vm1141_vm9 = vcmask 80896   ;;  %vm2609_vm10 = vmmov 0  }
  0x3d   : > { %545 = vmatprep.subr.mxu1 %v382_v10  ;;  %v2747_v17 = vld [vmem:[%s2744_s16] sm:$0xff]  ;;  %451 = vmatpush1.msra.mxu0 %v390_v11  ;;  %v402_v20 = vrot.slane %v2750_v18, 1  ;;  %v607_v24 = vld [vmem:[#allocation2 + $0xb0] sm:$0xf]  ;;  %v404_v25 = vrot.slane %v2755_v22, 1  ;;  %v606_v26 = vld [vmem:[#allocation2 + $0xa8] sm:$0xff] }
  0x3e   : > { %546 = vmatpush1.msra.mxu1 %v381_v12  ;;  %v401_v19 = vrot.slane %v2747_v17, 1  ;;  %452 = vmatprep.subr.mxu0 %v389_v13  ;;  %v726_v27 = vld [vmem:[#allocation2 + $0xf8] sm:$0xf]  ;;  %v605_v31 = vld [vmem:[#allocation2 + $0xa0] sm:$0xff]  ;;  %v603_v33 = vld [vmem:[#allocation2 + $0x90] sm:$0xff]  ;;  %v610_v36 = vrot.slane %v2747_v17, 2 }
  0x3f   : > { %547 = vmatprep.subr.mxu1 %v380_v14  ;;  %453 = vmatpush1.msra.mxu0 %v388_v15  ;;  %v2763_v28 = vld [vmem:[%s2744_s16 + $0x18] sm:$0xf]  ;;  %v405_v29 = vsel %vm400_vm1, %v402_v20, %v404_v25  ;;  %v725_v34 = vld [vmem:[#allocation2 + $0xf0] sm:$0xf]  ;;  %v611_v37 = vrot.slane %v2750_v18, 2  ;;  %v724_v38 = vld [vmem:[#allocation2 + $0xe8] sm:$0xff] }
  0x40   : > { %548 = vmatpush1.msra.mxu1 %v379_v16  ;;  %v403_v23 = vsel %vm400_vm1, %v401_v19, %v402_v20  ;;  %2185 = vmatprep.subr.msk.mxu0 %vm415_vm0, %v608_v21  ;;  %v406_v30 = vrot.slane %v2763_v28, 1  ;;  %v604_v32 = vld [vmem:[#allocation2 + $0x98] sm:$0xff]  ;;  %v602_v39 = vld [vmem:[#allocation2 + $0x88] sm:$0xff]  ;;  %v723_v40 = vld [vmem:[#allocation2 + $0xe0] sm:$0xff]  ;;  %v728_v43 = vrot.slane %v2747_v17, 3  ;;  %v729_v44 = vrot.slane %v2750_v18, 3 }
  0x41   : > { %2177 = vmatmul.mubr.msk.f32.vlgmr.msra.gmra.mxu0 %vm408_vm2, %v403_v23  ;;  %2182 = vmatmul.mubr.msk.f32.vlgmr.msra.gmra.mxu1 %vm408_vm2, %v2747_v17  ;;  %v601_v41 = vld [vmem:[#allocation2 + $0x80] sm:$0xff]  ;;  %v722_v42 = vld [vmem:[#allocation2 + $0xd8] sm:$0xff]  ;;  %v721_v45 = vld [vmem:[#allocation2 + $0xd0] sm:$0xff]  ;;  %v612_v46 = vsel %vm609_vm3, %v610_v36, %v611_v37  ;;  %v613_v49 = vrot.slane %v2755_v22, 2  ;;  %v731_v53 = vrot.slane %v2755_v22, 3  ;;  %v615_v56 = vrot.slane %v2763_v28, 2 }
  0x42   : > { %492 = vmatprep.mubr.f32.mxu0 %v2607_v0  ;;  %2186 = vmatpush1.msk.msra.mxu0 %vm415_vm0, %v607_v24  ;;  %v407_v35 = vsel %vm400_vm1, %v404_v25, %v406_v30  ;;  %v720_v47 = vld [vmem:[#allocation2 + $0xc8] sm:$0xff]  ;;  %v844_v48 = vld [vmem:[#allocation2 + $0x138] sm:$0xf]  ;;  %v719_v50 = vld [vmem:[#allocation2 + $0xc0] sm:$0xff]  ;;  %v730_v52 = vsel %vm727_vm4, %v728_v43, %v729_v44  ;;  %v733_v60 = vrot.slane %v2763_v28, 3  ;;  %v845_v1 = vrot.slane %v2747_v17, 4 }
  0x43   : > { %587 = vmatprep.mubr.f32.mxu1 %v2607_v0  ;;  %655 = vmatprep.subr.mxu0 %v606_v26  ;;  %v843_v51 = vld [vmem:[#allocation2 + $0x130] sm:$0xf]  ;;  %v842_v54 = vld [vmem:[#allocation2 + $0x128] sm:$0xff]  ;;  %v614_v55 = vsel %vm609_vm3, %v611_v37, %v613_v49  ;;  %v841_v57 = vld [vmem:[#allocation2 + $0x120] sm:$0xff]  ;;  %v732_v58 = vsel %vm727_vm4, %v729_v44, %v731_v53  ;;  %v616_v62 = vsel %vm609_vm3, %v613_v49, %v615_v56  ;;  %v846_v2 = vrot.slane %v2750_v18, 4  ;;  %s2610_s22 = smov 112  }
  0x44   : > { %2190 = vmatprep.subr.msk.mxu1 %vm415_vm0, %v726_v27  ;;  %656 = vmatpush1.msra.mxu0 %v605_v31  ;;  %v840_v59 = vld [vmem:[#allocation2 + $0x118] sm:$0xff]  ;;  %v839_v61 = vld [vmem:[#allocation2 + $0x110] sm:$0xff]  ;;  %v838_v63 = vld [vmem:[#allocation2 + $0x108] sm:$0xff]  ;;  %v734_v4 = vsel %vm727_vm4, %v731_v53, %v733_v60  ;;  %v848_v6 = vrot.slane %v2755_v22, 4  ;;  %v850_v8 = vrot.slane %v2763_v28, 4  ;;  %vm1641_vm11 = vcmask 916480  }
  0x45   : > { %2178 = vmatmul.mubr.msk.f32.gmra.mxu0 %vm408_vm2, %v405_v29  ;;  %2183 = vmatmul.mubr.msk.f32.gmra.mxu1 %vm408_vm2, %v2750_v18  ;;  %v837_v3 = vld [vmem:[#allocation2 + $0x100] sm:$0xff]  ;;  %v847_v5 = vsel %vm415_vm0, %v845_v1, %v846_v2  ;;  %v1108_v10 = vld [vmem:[#allocation4 + $0x78] sm:$0xff]  ;;  %v1107_v11 = vld [vmem:[#allocation4 + $0x70] sm:$0xff]  ;;  %s2174_s21 = sshll.u32 %s3169_s12, 3 }
  0x46   : > { %498 = vmatprep.mubr.f32.mxu0 %v2607_v0  ;;  %657 = vmatprep.subr.mxu0 %v604_v32  ;;  %v849_v7 = vsel %vm415_vm0, %v846_v2, %v848_v6  ;;  %v851_v9 = vsel %vm415_vm0, %v848_v6, %v850_v8  ;;  %v1127_v12 = vld [vmem:[#allocation4 + $0x108] sm:$0xff]  ;;  %v1126_v13 = vld [vmem:[#allocation4 + $0x100] sm:$0xff]  ;;  %v1125_v15 = vld [vmem:[#allocation4 + $0xf8] sm:$0xff]  ;;  %s374_s24 = scalar_lea.vmem %s3165_s9, %s2174_s21 }
  0x47   : > { %593 = vmatprep.mubr.f32.mxu1 %v2607_v0  ;;  %658 = vmatpush1.msra.mxu0 %v603_v33  ;;  %v1106_v14 = vld [vmem:[#allocation4 + $0x68] sm:$0xff]  ;;  %v1105_v16 = vld [vmem:[#allocation4 + $0x60] sm:$0xff]  ;;  %v1124_v17 = vld [vmem:[#allocation4 + $0xf0] sm:$0xff] }
  0x48   : > { %2191 = vmatpush1.msk.msra.mxu1 %vm415_vm0, %v725_v34  ;;  %659 = vmatprep.subr.mxu0 %v602_v39  ;;  %v1104_v18 = vld [vmem:[#allocation4 + $0x58] sm:$0xff]  ;;  %v1123_v19 = vld [vmem:[#allocation4 + $0xe8] sm:$0xff]  ;;  %v1103_v20 = vld [vmem:[#allocation4 + $0x50] sm:$0xff] }
  0x49   : > { %2179 = vmatmul.mubr.msk.f32.gmra.mxu0 %vm408_vm2, %v407_v35  ;;  %2184 = vmatmul.mubr.msk.f32.gmra.mxu1 %vm408_vm2, %v2755_v22  ;;  %v1122_v21 = vld [vmem:[#allocation4 + $0xe0] sm:$0xff]  ;;  %v1102_v22 = vld [vmem:[#allocation4 + $0x48] sm:$0xff]  ;;  %v1121_v23 = vld [vmem:[#allocation4 + $0xd8] sm:$0xff] }
  0x4a   : > { %773 = vmatprep.subr.mxu1 %v724_v38  ;;  %660 = vmatpush1.msra.mxu0 %v601_v41  ;;  %v1101_v24 = vld [vmem:[#allocation4 + $0x40] sm:$0xff]  ;;  %v1120_v25 = vld [vmem:[#allocation4 + $0xd0] sm:$0xff]  ;;  %v1100_v26 = vld [vmem:[#allocation4 + $0x38] sm:$0xff] }
  0x4b   : > { %774 = vmatpush1.msra.mxu1 %v723_v40  ;;  %693 = vmatprep.mubr.f32.mxu0 %v2607_v0  ;;  %v1119_v27 = vld [vmem:[#allocation4 + $0xc8] sm:$0xff]  ;;  %v1099_v28 = vld [vmem:[#allocation4 + $0x30] sm:$0xff]  ;;  %v1118_v29 = vld [vmem:[#allocation4 + $0xc0] sm:$0xff] }
  0x4c   : > { %775 = vmatprep.subr.mxu1 %v722_v42  ;;  %2195 = vmatprep.subr.msk.mxu0 %vm415_vm0, %v844_v48  ;;  %v1098_v30 = vld [vmem:[#allocation4 + $0x28] sm:$0xff]  ;;  %v1117_v31 = vld [vmem:[#allocation4 + $0xb8] sm:$0xff]  ;;  %v1097_v32 = vld [vmem:[#allocation4 + $0x20] sm:$0xff] }
  0x4d   : > { %776 = vmatpush1.msra.mxu1 %v721_v45  ;;  %2187 = vmatmul.mubr.msk.f32.vlgmr.msra.gmra.mxu0 %vm408_vm2, %v612_v46  ;;  %v1116_v33 = vld [vmem:[#allocation4 + $0xb0] sm:$0xff]  ;;  %v1096_v34 = vld [vmem:[#allocation4 + $0x18] sm:$0xff]  ;;  %v1115_v35 = vld [vmem:[#allocation4 + $0xa8] sm:$0xff] }
  0x4e   : > { %777 = vmatprep.subr.mxu1 %v720_v47  ;;  %811 = vmatprep.mubr.f32.mxu1 %v2607_v0  ;;  %v1095_v36 = vld [vmem:[#allocation4 + $0x10] sm:$0xff]  ;;  %v1094_v37 = vld [vmem:[#allocation4 + $0x8] sm:$0xff]  ;;  %v953_v1 = vld [vmem:[%s3158_s2] sm:$0x3] }
  0x4f   : > { %778 = vmatpush1.msra.mxu1 %v719_v50  ;;  %2196 = vmatpush1.msk.msra.mxu0 %vm415_vm0, %v843_v51  ;;  %v955_v50 = vlaneseq }
  0x50   : > { %2192 = vmatmul.mubr.msk.f32.vlgmr.msra.gmra.mxu1 %vm408_vm2, %v730_v52  ;;  %699 = vmatprep.mubr.f32.mxu0 %v2607_v0 }
  0x51   : > { %890 = vmatprep.subr.mxu0 %v842_v54  ;;  %2188 = vmatmul.mubr.msk.f32.gmra.mxu0 %vm408_vm2, %v614_v55  ;;  %v2853_v54 = vshrl.u32 %v955_v50, 7 }
  0x52   : > { %817 = vmatprep.mubr.f32.mxu1 %v2607_v0  ;;  %891 = vmatpush1.msra.mxu0 %v841_v57 }
  0x53   : > { %705 = vmatprep.mubr.f32.mxu0 %v2607_v0  ;;  %892 = vmatprep.subr.mxu0 %v840_v59 }
  0x54   : > { %2193 = vmatmul.mubr.msk.f32.gmra.mxu1 %vm408_vm2, %v732_v58  ;;  %893 = vmatpush1.msra.mxu0 %v839_v61 }
  0x55   : > { %823 = vmatprep.mubr.f32.mxu1 %v2607_v0  ;;  %2189 = vmatmul.mubr.msk.f32.gmra.mxu0 %vm408_vm2, %v616_v62  ;;  %v957_v62 = vsub.s32 0, %v2853_v54 }
  0x56   : > { %894 = vmatprep.subr.mxu0 %v838_v63  ;;  %928 = vmatprep.mubr.f32.mxu0 %v2607_v0 }
  0x57   : > { %895 = vmatpush1.msra.mxu0 %v837_v3  ;;  %1147 = vmatprep.subr.mxu1 %v2607_v0 }
  0x58   : > { %2194 = vmatmul.mubr.msk.f32.gmra.mxu1 %vm408_vm2, %v734_v4  ;;  %1222 = vmatprep.subr.mxu0 %v2607_v0  ;;  %v961_v4 = vsub.s32 1, %v2853_v54 }
  0x59   : > { %2197 = vmatmul.mubr.msk.f32.vlgmr.msra.gmra.mxu0 %vm408_vm2, %v847_v5  ;;  %1148 = vmatpush1.msra.mxu1 %v1127_v12 }
  0x5a   : > { %934 = vmatprep.mubr.f32.mxu0 %v2607_v0  ;;  %1223 = vmatpush1.msra.mxu0 %v1108_v10  ;;  %v958_v10 = vrot.slane %v953_v1, %v957_v62 }
  0x5b   : > { %1224 = vmatprep.subr.mxu0 %v2607_v0  ;;  %1149 = vmatprep.subr.mxu1 %v2607_v0 }
  0x5c   : > { %1225 = vmatpush1.msra.mxu0 %v1107_v11  ;;  %1150 = vmatpush1.msra.mxu1 %v1126_v13 }
  0x5d   : > { %2198 = vmatmul.mubr.msk.f32.gmra.mxu0 %vm408_vm2, %v849_v7  ;;  %1226 = vmatprep.subr.mxu0 %v2607_v0 }
  0x5e   : > { %940 = vmatprep.mubr.f32.mxu0 %v2607_v0  ;;  %1151 = vmatprep.subr.mxu1 %v2607_v0 }
  0x5f   : > { %1227 = vmatpush1.msra.mxu0 %v1106_v14  ;;  %1152 = vmatpush1.msra.mxu1 %v1125_v15  ;;  %v962_v15 = vrot.slane %v953_v1, %v961_v4 }
  0x60   : > { %1228 = vmatprep.subr.mxu0 %v2607_v0  ;;  %1153 = vmatprep.subr.mxu1 %v2607_v0 }
  0x61   : > { %2199 = vmatmul.mubr.msk.f32.gmra.mxu0 %vm408_vm2, %v851_v9  ;;  %1154 = vmatpush1.msra.mxu1 %v1124_v17 }
  0x62   : > { %1229 = vmatpush1.msra.mxu0 %v1105_v16  ;;  %1155 = vmatprep.subr.mxu1 %v2607_v0 }
  0x63   : > { %1230 = vmatprep.subr.mxu0 %v2607_v0  ;;  %1156 = vmatpush1.msra.mxu1 %v1123_v19 }
  0x64   : > { %1231 = vmatpush1.msra.mxu0 %v1104_v18  ;;  %1157 = vmatprep.subr.mxu1 %v2607_v0 }
  0x65   : > { %1232 = vmatprep.subr.mxu0 %v2607_v0  ;;  %1158 = vmatpush1.msra.mxu1 %v1122_v21 }
  0x66   : > { %1233 = vmatpush1.msra.mxu0 %v1103_v20  ;;  %1159 = vmatprep.subr.mxu1 %v2607_v0 }
  0x67   : > { %1234 = vmatprep.subr.mxu0 %v2607_v0  ;;  %1160 = vmatpush1.msra.mxu1 %v1121_v23 }
  0x68   : > { %1235 = vmatpush1.msra.mxu0 %v1102_v22  ;;  %1161 = vmatprep.subr.mxu1 %v2607_v0 }
  0x69   : > { %1236 = vmatprep.subr.mxu0 %v2607_v0  ;;  %1162 = vmatpush1.msra.mxu1 %v1120_v25 }
  0x6a   : > { %1237 = vmatpush1.msra.mxu0 %v1101_v24  ;;  %1163 = vmatprep.subr.mxu1 %v2607_v0 }
  0x6b   : > { %1238 = vmatprep.subr.mxu0 %v2607_v0  ;;  %1164 = vmatpush1.msra.mxu1 %v1119_v27 }
  0x6c   : > { %1239 = vmatpush1.msra.mxu0 %v1100_v26  ;;  %1165 = vmatprep.subr.mxu1 %v2607_v0 }
  0x6d   : > { %1240 = vmatprep.subr.mxu0 %v2607_v0  ;;  %1166 = vmatpush1.msra.mxu1 %v1118_v29 }
  0x6e   : > { %1241 = vmatpush1.msra.mxu0 %v1099_v28  ;;  %1167 = vmatprep.subr.mxu1 %v2607_v0 }
  0x6f   : > { %1242 = vmatprep.subr.mxu0 %v2607_v0  ;;  %1168 = vmatpush1.msra.mxu1 %v1117_v31 }
  0x70   : > { %1243 = vmatpush1.msra.mxu0 %v1098_v30  ;;  %1169 = vmatprep.subr.mxu1 %v2607_v0 }
  0x71   : > { %1244 = vmatprep.subr.mxu0 %v2607_v0  ;;  %1170 = vmatpush1.msra.mxu1 %v1116_v33 }
  0x72   : > { %1245 = vmatpush1.msra.mxu0 %v1097_v32  ;;  %1171 = vmatprep.subr.mxu1 %v2607_v0 }
  0x73   : > { %1246 = vmatprep.subr.mxu0 %v2607_v0  ;;  %1172 = vmatpush1.msra.mxu1 %v1115_v35 }
  0x74   : > { %1247 = vmatpush1.msra.mxu0 %v1096_v34  ;;  %1173 = vmatprep.subr.mxu1 %v2607_v0 }
  0x75   : > { %1248 = vmatprep.subr.mxu0 %v2607_v0 }
  0x76   : > { %1249 = vmatpush1.msra.mxu0 %v1095_v36 }
  0x77   : > { %1250 = vmatprep.subr.mxu0 %v2607_v0 }
  0x78   : > { %1251 = vmatpush1.msra.mxu0 %v1094_v37 }
  0x79   : > { %1252 = vmatprep.subr.mxu0 %v2607_v0 }
 0x101   : > { %v488_v38 = vpop.f32.mrf.mxu0  ;;  %v583_v39 = vpop.f32.mrf.mxu1 }
 0x102   : > { %v584_v57 = vadd.f32 %v583_v39, %v488_v38 }
 0x103   : > { %v490_v40 = vpop.f32.mrf.mxu0  ;;  %v585_v41 = vpop.f32.mrf.mxu1 }
 0x104   : > { %v586_v59 = vadd.f32 %v585_v41, %v490_v40 }
 0x105   : > { %v494_v42 = vpop.f32.mrf.mxu0  ;;  %v589_v43 = vpop.f32.mrf.mxu1 }
 0x106   : > { %v590_v2 = vadd.f32 %v589_v43, %v494_v42 }
 0x107   : > { %v496_v44 = vpop.f32.mrf.mxu0  ;;  %v591_v45 = vpop.f32.mrf.mxu1 }
 0x108   : > { %v592_v6 = vadd.f32 %v591_v45, %v496_v44 }
 0x109   : > { %v500_v46 = vpop.f32.mrf.mxu0  ;;  %v595_v47 = vpop.f32.mrf.mxu1 }
 0x10a   : > { %v596_v16 = vadd.f32 %v595_v47, %v500_v46 }
 0x10b   : > { %v502_v48 = vpop.f32.mrf.mxu0  ;;  %v597_v51 = vpop.f32.mrf.mxu1 }
 0x10c   : > { %v598_v22 = vadd.f32 %v597_v51, %v502_v48 }
 0x10d   : > { %v695_v49 = vpop.f32.mrf.mxu0 }
 0x10e   : > { %v712_v60 = vadd.f32 %v695_v49, %v584_v57 }
 0x10f   : > { %v697_v52 = vpop.f32.mrf.mxu0 }
 0x110   : > { %v813_v53 = vpop.f32.mrf.mxu1  ;;  %v713_v3 = vadd.f32 %v697_v52, %v586_v59 }
 0x111   : > { %v701_v55 = vpop.f32.mrf.mxu0  ;;  %v830_v7 = vadd.f32 %v813_v53, %v712_v60 }
 0x112   : > { %v815_v56 = vpop.f32.mrf.mxu1  ;;  %v714_v8 = vadd.f32 %v701_v55, %v590_v2 }
 0x113   : > { %v703_v58 = vpop.f32.mrf.mxu0  ;;  %v831_v12 = vadd.f32 %v815_v56, %v713_v3 }
 0x114   : > { %v819_v61 = vpop.f32.mrf.mxu1  ;;  %v715_v13 = vadd.f32 %v703_v58, %v592_v6  ;;  %v1114_v6 = vld [vmem:[#allocation4 + $0xa0] sm:$0xff] }
 0x115   : > { %v707_v63 = vpop.f32.mrf.mxu0  ;;  %v832_v18 = vadd.f32 %v819_v61, %v714_v8  ;;  %v1113_v8 = vld [vmem:[#allocation4 + $0x98] sm:$0xff]  ;;  %1174 = vmatpush1.msra.mxu1 %v1114_v6 }
 0x116   : > { %v821_v9 = vpop.f32.mrf.mxu1  ;;  %v716_v23 = vadd.f32 %v707_v63, %v596_v16  ;;  %1175 = vmatprep.subr.mxu1 %v2607_v0 }
 0x117   : > { %v709_v5 = vpop.f32.mrf.mxu0  ;;  %v833_v25 = vadd.f32 %v821_v9, %v715_v13  ;;  %v1110_v13 = vld [vmem:[#allocation4 + $0x88] sm:$0x3]  ;;  %1176 = vmatpush1.msra.mxu1 %v1113_v8 }
 0x118   : > { %v825_v19 = vpop.f32.mrf.mxu1  ;;  %v717_v29 = vadd.f32 %v709_v5, %v598_v22  ;;  %1177 = vmatprep.subr.mxu1 %v2607_v0 }
 0x119   : > { %v930_v11 = vpop.f32.mrf.mxu0  ;;  %v834_v36 = vadd.f32 %v825_v19, %v716_v23 }
 0x11a   : > { %v947_v14 = vadd.f32 %v930_v11, %v830_v7  ;;  %v827_v31 = vpop.f32.mrf.mxu1  ;;  %v1093_v7 = vld [vmem:[#allocation4] sm:$0xff] }
 0x11b   : > { %v932_v17 = vpop.f32.mrf.mxu0  ;;  %v835_v42 = vadd.f32 %v827_v31, %v717_v29  ;;  %1253 = vmatpush1.msra.mxu0 %v1093_v7 }
 0x11c   : > { %v965_v20 = vadd.f32 %v958_v10, %v947_v14  ;;  %v948_v21 = vadd.f32 %v932_v17, %v831_v12  ;;  %1282 = vmatprep.subr.mxu0 %v2607_v0  ;;  %v1112_v17 = vld [vmem:[#allocation4 + $0x90] sm:$0xff] }
 0x11d   : > { %v936_v24 = vpop.f32.mrf.mxu0  ;;  %2202 = vmatpush2.msk.msra.mxu0 %vm1050_vm6, %v1110_v13  ;;  %1178 = vmatpush1.msra.mxu1 %v1112_v17 }
 0x11e   : > { %v971_v26 = vmax.f32 %v965_v20, 0.0  ;;  %v966_v27 = vadd.f32 %v962_v15, %v948_v21  ;;  %v949_v28 = vadd.f32 %v936_v24, %v832_v18  ;;  %v1109_v18 = vld [vmem:[#allocation4 + $0x80] sm:$0xff]  ;;  %1284 = vmatprep.subr.mxu0 %v2607_v0  ;;  %1207 = vmatprep.subr.mxu1 %v2607_v0 }
 0x11f   : > { %v938_v30 = vpop.f32.mrf.mxu0  ;;  %1285 = vmatpush2.msra.mxu0 %v1109_v18  ;;  %v1407_v18 = vld [vmem:[#allocation4 + $0x210] sm:$0xff] }
 0x120   : > { %v979_v32 = vrot.slane %v971_v26, 1  ;;  %v972_v33 = vmax.f32 %v966_v27, 0.0  ;;  %v967_v34 = vadd.f32 %v958_v10, %v949_v28  ;;  %v950_v35 = vadd.f32 %v938_v30, %v833_v25  ;;  %v1129_v27 = vld [vmem:[#allocation4 + $0x118] sm:$0x3]  ;;  %1425 = vmatprep.subr.mxu0 %v2607_v0 }
 0x121   : > { %v942_v37 = vpop.f32.mrf.mxu0  ;;  %2200 = vmatpush2.msk.msra.mxu1 %vm1050_vm6, %v1129_v27  ;;  %v1302_v27 = vld [vmem:[#allocation4 + $0x168] sm:$0xff] }
 0x122   : > { %v983_v38 = vmax.f32 %v971_v26, %v979_v32  ;;  %v980_v39 = vrot.slane %v972_v33, 1  ;;  %v973_v40 = vmax.f32 %v967_v34, 0.0  ;;  %v968_v41 = vadd.f32 %v962_v15, %v950_v35  ;;  %v1128_v35 = vld [vmem:[#allocation4 + $0x110] sm:$0xff]  ;;  %1209 = vmatprep.subr.mxu1 %v2607_v0 }
 0x123   : > { %v951_v43 = vadd.f32 %v942_v37, %v834_v36  ;;  %v944_v44 = vpop.f32.mrf.mxu0  ;;  %1210 = vmatpush2.msra.mxu1 %v1128_v35  ;;  %v1298_v35 = vld [vmem:[#allocation4 + $0x148] sm:$0xff] }
 0x124   : > { %v1003_v45 = vrot.slane %v983_v38, 1  ;;  %v1007_v46 = vrot.slane %v983_v38, 2  ;;  %v984_v47 = vmax.f32 %v972_v33, %v980_v39  ;;  %v987_v48 = vrot.slane %v973_v40, 1  ;;  %1323 = vmatprep.subr.mxu1 %v2607_v0 }
 0x125   : > { %v974_v49 = vmax.f32 %v968_v41, 0.0  ;;  %v969_v50 = vadd.f32 %v958_v10, %v951_v43  ;;  %v952_v51 = vadd.f32 %v944_v44, %v835_v42  ;;  %v1011_v59 = vrot.slane %v983_v38, 3 }
 0x126   : > { %v1048_v52 = vsel %vm1047_vm5, %v983_v38, %v1003_v45  ;;  %v1004_v53 = vrot.slane %v984_v47, 1  ;;  %v991_v55 = vmax.f32 %v973_v40, %v987_v48  ;;  %v1008_v3 = vrot.slane %v984_v47, 2 }
 0x127   : > { %v988_v56 = vrot.slane %v974_v49, 1  ;;  %v975_v57 = vmax.f32 %v969_v50, 0.0  ;;  %v970_v58 = vadd.f32 %v962_v15, %v952_v51  ;;  %v1051_v60 = vsel %vm1050_vm6, %v1048_v52, %v1007_v46 }
 0x128   : > { %v1017_v61 = vrot.slane %v991_v55, 4  ;;  %v1021_v4 = vrot.slane %v991_v55, 5  ;;  %v1054_v5 = vsel %vm1053_vm7, %v1051_v60, %v1011_v59  ;;  %v1049_v9 = vsel %vm1047_vm5, %v984_v47, %v1004_v53  ;;  %v1410_v60 = vld [vmem:[#allocation4 + $0x228] sm:$0xff] }
 0x129   : > { %v2864_v63 = vmax.f32 %v974_v49, %v988_v56  ;;  %v995_v1 = vrot.slane %v975_v57, 1  ;;  %v976_v2 = vmax.f32 %v970_v58, 0.0  ;;  %v1012_v14 = vrot.slane %v984_v47, 3 }
 0x12a   : > { %v1056_v12 = vsel %vm415_vm0, %v1054_v5, %v1017_v61  ;;  %v1025_v15 = vrot.slane %v991_v55, 6  ;;  %v1029_v23 = vrot.slane %v991_v55, 7  ;;  %v1052_v26 = vsel %vm1050_vm6, %v1049_v9, %v1008_v3  ;;  %v1409_v3 = vld [vmem:[#allocation4 + $0x220] sm:$0xff] }
 0x12b   : > { %v999_v10 = vmax.f32 %v975_v57, %v995_v1  ;;  %v996_v11 = vrot.slane %v976_v2, 1  ;;  %v1058_v16 = vsel %vm727_vm4, %v1056_v12, %v1021_v4  ;;  %v1018_v22 = vrot.slane %v2864_v63, 4 }
 0x12c   : > { %v1060_v24 = vsel %vm609_vm3, %v1058_v16, %v1025_v15  ;;  %v1022_v25 = vrot.slane %v2864_v63, 5  ;;  %v1055_v34 = vsel %vm1053_vm7, %v1052_v26, %v1012_v14  ;;  %v1026_v42 = vrot.slane %v2864_v63, 6  ;;  %v1408_v14 = vld [vmem:[#allocation4 + $0x218] sm:$0xff]  ;;  %v1307_v16 = vld [vmem:[#allocation4 + $0x190] sm:$0xff] }
 0x12d   : > { %v1000_v19 = vmax.f32 %v976_v2, %v996_v11  ;;  %v1035_v20 = vrot.slane %v999_v10, 1  ;;  %v1039_v21 = vrot.slane %v999_v10, 2  ;;  %v1043_v28 = vrot.slane %v999_v10, 3  ;;  %v1308_v11 = vld [vmem:[#allocation4 + $0x198] sm:$0xff]  ;;  %v1403_v26 = vld [vmem:[#allocation4 + $0x1f0] sm:$0xff] }
 0x12e   : > { %v1062_v32 = vsel %vm400_vm1, %v1060_v24, %v1029_v23  ;;  %v1057_v39 = vsel %vm415_vm0, %v1055_v34, %v1018_v22  ;;  %v1030_v46 = vrot.slane %v2864_v63, 7  ;;  %v1405_v22 = vld [vmem:[#allocation4 + $0x200] sm:$0xff]  ;;  %v1304_v23 = vld [vmem:[#allocation4 + $0x178] sm:$0xff]  ;;  %v1399_v34 = vld [vmem:[#allocation4 + $0x1d0] sm:$0xff] }
 0x12f   : > { %v1064_v29 = vsel %vm1047_vm5, %v999_v10, %v1035_v20  ;;  %v1036_v30 = vrot.slane %v1000_v19, 1  ;;  %v1040_v31 = vrot.slane %v1000_v19, 2  ;;  %v1044_v37 = vrot.slane %v1000_v19, 3  ;;  %v1406_v20 = vld [vmem:[#allocation4 + $0x208] sm:$0xff]  ;;  %v1404_v24 = vld [vmem:[#allocation4 + $0x1f8] sm:$0xff] }
 0x130   : > { %v1066_v33 = vsel %vm1050_vm6, %v1064_v29, %v1039_v21  ;;  %v1059_v43 = vsel %vm727_vm4, %v1057_v39, %v1022_v25  ;;  %v1305_v21 = vld [vmem:[#allocation4 + $0x180] sm:$0xff]  ;;  %v1303_v25 = vld [vmem:[#allocation4 + $0x170] sm:$0xff]  ;;  %v1296_v39 = vld [vmem:[#allocation4 + $0x138] sm:$0xff] }
 0x131   : > { %v1068_v36 = vsel %vm1053_vm7, %v1066_v33, %v1043_v28  ;;  %v1065_v38 = vsel %vm1047_vm5, %v1000_v19, %v1036_v30  ;;  %v1061_v45 = vsel %vm609_vm3, %v1059_v43, %v1026_v42  ;;  %v1306_v19 = vld [vmem:[#allocation4 + $0x188] sm:$0xff]  ;;  %v1301_v29 = vld [vmem:[#allocation4 + $0x160] sm:$0xff]  ;;  %v1299_v33 = vld [vmem:[#allocation4 + $0x150] sm:$0xff] }
 0x132   : > { %v2501_v40 = vpack.i.bf16 %v1068_v36, %v1062_v32  ;;  %v1067_v41 = vsel %vm1050_vm6, %v1065_v38, %v1040_v31  ;;  %v1063_v47 = vsel %vm400_vm1, %v1061_v45, %v1030_v46  ;;  %v1402_v28 = vld [vmem:[#allocation4 + $0x1e8] sm:$0xff]  ;;  %v1401_v30 = vld [vmem:[#allocation4 + $0x1e0] sm:$0xff]  ;;  %v1300_v31 = vld [vmem:[#allocation4 + $0x158] sm:$0xff] }
 0x133   : > { %v1069_v44 = vsel %vm1053_vm7, %v1067_v41, %v1044_v37  ;;  %v1297_v37 = vld [vmem:[#allocation4 + $0x140] sm:$0xff]  ;;  %v1295_v41 = vld [vmem:[#allocation4 + $0x130] sm:$0xff]  ;;  %v1294_v43 = vld [vmem:[#allocation4 + $0x128] sm:$0xff] }
 0x134   : > { %2502 = vrot.lane.b32.xlu0 %v2501_v40, %s2608_s19  ;;  %1080 = vrot.lane.b32.xlu1 %v1069_v44, %s2608_s19  ;;  %v1397_v38 = vld [vmem:[#allocation4 + $0x1c0] sm:$0xff]  ;;  %v1396_v40 = vld [vmem:[#allocation4 + $0x1b8] sm:$0xff]  ;;  %v1395_v42 = vld [vmem:[#allocation4 + $0x1b0] sm:$0xff] }
 0x135   : > { %v1293_v45 = vld [vmem:[#allocation4 + $0x120] sm:$0xff] }
 0x138   : > { %1076 = vrot.lane.b32.xlu0 %v1063_v47, %s2608_s19 }
 0x1a6   : > { %v2503_v48 = vpop.permute.xlu0 %2502  ;;  %v1081_v49 = vpop.permute.xlu1 %1080 }
 0x1a7   : > { %v2505_v50 = vunpack.i.h.bf16 %v2503_v48  ;;  %v2504_v51 = vunpack.i.l.bf16 %v2503_v48  ;;  %v2898_v53 = vmax.f32 %v1069_v44, %v1081_v49  ;;  %v1412_v44 = vld [vmem:[#allocation4 + $0x238] sm:$0x3]  ;;  %v1310_v48 = vld [vmem:[#allocation4 + $0x1a8] sm:$0x3] }
 0x1a9   : > { %v1084_v52 = vsel %vm1082_vm8, %v2505_v50, %v1081_v49  ;;  %v1138_v63 = vrot.slane %v2898_v53, 1  ;;  %v1417_v2 = vrot.slane %v2898_v53, 3  ;;  %v1315_v12 = vrot.slane %v2898_v53, 2 }
 0x1aa   : > { %v2900_v55 = vmax.f32 %v1068_v36, %v1084_v52  ;;  %v1077_v56 = vpop.permute.xlu0 %1076  ;;  %v1398_v36 = vld [vmem:[#allocation4 + $0x1c8] sm:$0xff]  ;;  %v1309_v52 = vld [vmem:[#allocation4 + $0x1a0] sm:$0xff] }
 0x1ab   : > { %v1083_v57 = vsel %vm1082_vm8, %v2504_v51, %v1077_v56  ;;  %v2902_v58 = vmax.f32 %v1063_v47, %v1077_v56  ;;  %v1411_v47 = vld [vmem:[#allocation4 + $0x230] sm:$0xff] }
 0x1ac   : > { %v2904_v59 = vmax.f32 %v1062_v32, %v1083_v57  ;;  %v1135_v5 = vrot.slane %v2900_v55, 1  ;;  %v1516_v13 = vrot.slane %v2900_v55, 4  ;;  %v1400_v32 = vld [vmem:[#allocation4 + $0x1d8] sm:$0xff]  ;;  %v1414_v49 = vrot.slane %v2900_v55, 3 }
 0x1ad   : > { %2203 = vmatprep.mubr.msk.f32.mxu0 %vm1141_vm9, %v2902_v58  ;;  %v1137_v61 = vrot.slane %v2902_v58, 1  ;;  %v1416_v1 = vrot.slane %v2902_v58, 3  ;;  %v1314_v6 = vrot.slane %v2902_v58, 2  ;;  %v1518_v56 = vrot.slane %v2902_v58, 4 }
 0x1ae   : > { %1287 = vmatmul.mubr.f32.vlgmr.msra.gmra.mxu0 %v2904_v59  ;;  %v1134_v4 = vrot.slane %v2904_v59, 1  ;;  %v1515_v7 = vrot.slane %v2904_v59, 4  ;;  %v1413_v46 = vrot.slane %v2904_v59, 3  ;;  %v1311_v50 = vrot.slane %v2904_v59, 2 }
 0x1af   : > { %1426 = vmatpush1.msra.mxu0 %v1410_v60  ;;  %v1139_v8 = vsel %vm400_vm1, %v1137_v61, %v1138_v63  ;;  %v1418_v9 = vsel %vm727_vm4, %v1416_v1, %v1417_v2  ;;  %v1316_v15 = vsel %vm609_vm3, %v1314_v6, %v1315_v12  ;;  %v1312_v57 = vrot.slane %v2900_v55, 2  ;;  %v1512_v60 = vld [vmem:[#allocation4 + $0x2b8] sm:$0xff]  ;;  %v1511_v63 = vld [vmem:[#allocation4 + $0x2b0] sm:$0xff]  ;;  %v1510_v55 = vld [vmem:[#allocation4 + $0x2a8] sm:$0xff] }
 0x1b0   : > { %1427 = vmatprep.subr.mxu0 %v2607_v0  ;;  %2201 = vmatprep.mubr.msk.f32.mxu1 %vm1141_vm9, %v1139_v8  ;;  %v1136_v10 = vsel %vm400_vm1, %v1134_v4, %v1135_v5  ;;  %v2928_v17 = vsel %vm415_vm0, %v1515_v7, %v1516_v13  ;;  %v1415_v51 = vsel %vm727_vm4, %v1413_v46, %v1414_v49  ;;  %v1519_v61 = vrot.slane %v2898_v53, 4  ;;  %v1509_v53 = vld [vmem:[#allocation4 + $0x2a0] sm:$0xff]  ;;  %v1508_v1 = vld [vmem:[#allocation4 + $0x298] sm:$0xff]  ;;  %v1507_v2 = vld [vmem:[#allocation4 + $0x290] sm:$0xff] }
 0x1b1   : > { %1428 = vmatpush1.msra.mxu0 %v1409_v3  ;;  %2207 = vmatprep.mubr.msk.f32.mxu0 %vm1141_vm9, %v1418_v9  ;;  %v1313_v59 = vsel %vm609_vm3, %v1311_v50, %v1312_v57  ;;  %v1506_v3 = vld [vmem:[#allocation4 + $0x288] sm:$0xff]  ;;  %v1505_v4 = vld [vmem:[#allocation4 + $0x280] sm:$0xff]  ;;  %v1504_v5 = vld [vmem:[#allocation4 + $0x278] sm:$0xff] }
 0x1b2   : > { %1212 = vmatmul.mubr.f32.vlgmr.msra.gmra.mxu1 %v1136_v10  ;;  %1429 = vmatprep.subr.mxu0 %v2607_v0  ;;  %v1520_v58 = vsel %vm415_vm0, %v1518_v56, %v1519_v61  ;;  %v1503_v6 = vld [vmem:[#allocation4 + $0x270] sm:$0xff]  ;;  %v1502_v7 = vld [vmem:[#allocation4 + $0x268] sm:$0xff]  ;;  %v1501_v8 = vld [vmem:[#allocation4 + $0x260] sm:$0xff] }
 0x1b3   : > { %1324 = vmatpush1.msra.mxu1 %v1308_v11  ;;  %2205 = vmatprep.mubr.msk.f32.mxu1 %vm1141_vm9, %v1316_v15  ;;  %v1500_v9 = vld [vmem:[#allocation4 + $0x258] sm:$0xff]  ;;  %v1499_v10 = vld [vmem:[#allocation4 + $0x250] sm:$0xff]  ;;  %v1498_v11 = vld [vmem:[#allocation4 + $0x248] sm:$0xff] }
 0x1b4   : > { %1325 = vmatprep.subr.mxu1 %v2607_v0  ;;  %1430 = vmatpush1.msra.mxu0 %v1408_v14  ;;  %v1497_v12 = vld [vmem:[#allocation4 + $0x240] sm:$0xff]  ;;  %v1514_v13 = vld [vmem:[#allocation4 + $0x2c8] sm:$0x3]  ;;  %v1640_v15 = vld [vmem:[#allocation6 + $0x68] sm:$0xff] }
 0x1b5   : > { %1326 = vmatpush1.msra.mxu1 %v1307_v16  ;;  %1431 = vmatprep.subr.mxu0 %v2607_v0  ;;  %v1513_v14 = vld [vmem:[#allocation4 + $0x2c0] sm:$0xff]  ;;  %v1639_v16 = vld [vmem:[#allocation6 + $0x60] sm:$0xff] }
 0x1b6   : > { %1327 = vmatprep.subr.mxu1 %v2607_v0  ;;  %1432 = vmatpush1.msra.mxu0 %v1407_v18  ;;  %v1730_v18 = vld [vmem:[#allocation6 + $0xd8] sm:$0xff] }
 0x1b7   : > { %1328 = vmatpush1.msra.mxu1 %v1306_v19  ;;  %1433 = vmatprep.subr.mxu0 %v2607_v0  ;;  %v1729_v19 = vld [vmem:[#allocation6 + $0xd0] sm:$0xff] }
 0x1b8   : > { %1329 = vmatprep.subr.mxu1 %v2607_v0  ;;  %1434 = vmatpush1.msra.mxu0 %v1406_v20  ;;  %v1638_v20 = vld [vmem:[#allocation6 + $0x58] sm:$0xff] }
 0x1b9   : > { %1330 = vmatpush1.msra.mxu1 %v1305_v21  ;;  %1435 = vmatprep.subr.mxu0 %v2607_v0  ;;  %v1728_v21 = vld [vmem:[#allocation6 + $0xc8] sm:$0xff] }
 0x1ba   : > { %1331 = vmatprep.subr.mxu1 %v2607_v0  ;;  %1436 = vmatpush1.msra.mxu0 %v1405_v22  ;;  %v1727_v22 = vld [vmem:[#allocation6 + $0xc0] sm:$0xff] }
 0x1bb   : > { %1332 = vmatpush1.msra.mxu1 %v1304_v23  ;;  %1437 = vmatprep.subr.mxu0 %v2607_v0  ;;  %v1636_v23 = vld [vmem:[#allocation6 + $0x48] sm:$0xff] }
 0x1bc   : > { %1333 = vmatprep.subr.mxu1 %v2607_v0  ;;  %1438 = vmatpush1.msra.mxu0 %v1404_v24  ;;  %v1726_v24 = vld [vmem:[#allocation6 + $0xb8] sm:$0xff] }
 0x1bd   : > { %1334 = vmatpush1.msra.mxu1 %v1303_v25  ;;  %1439 = vmatprep.subr.mxu0 %v2607_v0  ;;  %v1635_v25 = vld [vmem:[#allocation6 + $0x40] sm:$0xff] }
 0x1be   : > { %1335 = vmatprep.subr.mxu1 %v2607_v0  ;;  %1440 = vmatpush1.msra.mxu0 %v1403_v26  ;;  %v1725_v26 = vld [vmem:[#allocation6 + $0xb0] sm:$0xff] }
 0x1bf   : > { %1336 = vmatpush1.msra.mxu1 %v1302_v27  ;;  %1441 = vmatprep.subr.mxu0 %v2607_v0  ;;  %v1634_v27 = vld [vmem:[#allocation6 + $0x38] sm:$0xff] }
 0x1c0   : > { %1337 = vmatprep.subr.mxu1 %v2607_v0  ;;  %1442 = vmatpush1.msra.mxu0 %v1402_v28  ;;  %v1724_v28 = vld [vmem:[#allocation6 + $0xa8] sm:$0xff] }
 0x1c1   : > { %1338 = vmatpush1.msra.mxu1 %v1301_v29  ;;  %1443 = vmatprep.subr.mxu0 %v2607_v0  ;;  %v1633_v29 = vld [vmem:[#allocation6 + $0x30] sm:$0xff] }
 0x1c2   : > { %1339 = vmatprep.subr.mxu1 %v2607_v0  ;;  %1444 = vmatpush1.msra.mxu0 %v1401_v30  ;;  %v1723_v30 = vld [vmem:[#allocation6 + $0xa0] sm:$0xff] }
 0x1c3   : > { %1340 = vmatpush1.msra.mxu1 %v1300_v31  ;;  %1445 = vmatprep.subr.mxu0 %v2607_v0  ;;  %v1632_v31 = vld [vmem:[#allocation6 + $0x28] sm:$0xff] }
 0x1c4   : > { %1341 = vmatprep.subr.mxu1 %v2607_v0  ;;  %1446 = vmatpush1.msra.mxu0 %v1400_v32  ;;  %v1722_v32 = vld [vmem:[#allocation6 + $0x98] sm:$0xff] }
 0x1c5   : > { %1342 = vmatpush1.msra.mxu1 %v1299_v33  ;;  %1447 = vmatprep.subr.mxu0 %v2607_v0  ;;  %v1631_v33 = vld [vmem:[#allocation6 + $0x20] sm:$0xff] }
 0x1c6   : > { %1343 = vmatprep.subr.mxu1 %v2607_v0  ;;  %1448 = vmatpush1.msra.mxu0 %v1399_v34  ;;  %v1721_v34 = vld [vmem:[#allocation6 + $0x90] sm:$0xff] }
 0x1c7   : > { %1344 = vmatpush1.msra.mxu1 %v1298_v35  ;;  %1449 = vmatprep.subr.mxu0 %v2607_v0  ;;  %v1630_v35 = vld [vmem:[#allocation6 + $0x18] sm:$0xff] }
 0x1c8   : > { %1345 = vmatprep.subr.mxu1 %v2607_v0  ;;  %1450 = vmatpush1.msra.mxu0 %v1398_v36  ;;  %v1720_v36 = vld [vmem:[#allocation6 + $0x88] sm:$0xff] }
 0x1c9   : > { %1346 = vmatpush1.msra.mxu1 %v1297_v37  ;;  %1451 = vmatprep.subr.mxu0 %v2607_v0  ;;  %v1629_v37 = vld [vmem:[#allocation6 + $0x10] sm:$0xff] }
 0x1ca   : > { %1347 = vmatprep.subr.mxu1 %v2607_v0  ;;  %1452 = vmatpush1.msra.mxu0 %v1397_v38  ;;  %v1719_v38 = vld [vmem:[#allocation6 + $0x80] sm:$0xff] }
 0x1cb   : > { %1348 = vmatpush1.msra.mxu1 %v1296_v39  ;;  %1453 = vmatprep.subr.mxu0 %v2607_v0  ;;  %v1628_v39 = vld [vmem:[#allocation6 + $0x8] sm:$0xff] }
 0x1cc   : > { %1349 = vmatprep.subr.mxu1 %v2607_v0  ;;  %1454 = vmatpush1.msra.mxu0 %v1396_v40 }
 0x1cd   : > { %1350 = vmatpush1.msra.mxu1 %v1295_v41  ;;  %1455 = vmatprep.subr.mxu0 %v2607_v0 }
 0x1ce   : > { %1351 = vmatprep.subr.mxu1 %v2607_v0  ;;  %1456 = vmatpush1.msra.mxu0 %v1395_v42 }
 0x1cf   : > { %1352 = vmatpush1.msra.mxu1 %v1294_v43  ;;  %1485 = vmatprep.subr.mxu0 %v2607_v0 }
 0x1d0   : > { %1353 = vmatprep.subr.mxu1 %v2607_v0  ;;  %2206 = vmatpush2.msk.msra.mxu0 %vm1050_vm6, %v1412_v44 }
 0x1d1   : > { %1354 = vmatpush1.msra.mxu1 %v1293_v45  ;;  %1487 = vmatprep.subr.mxu0 %v2607_v0 }
 0x1d2   : > { %1383 = vmatprep.subr.mxu1 %v2607_v0  ;;  %1488 = vmatpush2.msra.mxu0 %v1411_v47 }
 0x1d3   : > { %2204 = vmatpush2.msk.msra.mxu1 %vm1050_vm6, %v1310_v48  ;;  %1490 = vmatmul.mubr.f32.vlgmr.msra.gmra.mxu0 %v1415_v51 }
 0x1d4   : > { %1385 = vmatprep.subr.mxu1 %v2607_v0  ;;  %2295 = vmatprep.subr.mxu0 %v2607_v0 }
 0x1d5   : > { %1386 = vmatpush2.msra.mxu1 %v1309_v52  ;;  %2296 = vmatpush3.msra.mxu0 %v1640_v15  ;;  %v2210_v52 = vld [vmem:[%s3160_s4] ss:$0 sm:$0xff] }
 0x1d6   : > { %1388 = vmatmul.mubr.f32.vlgmr.msra.gmra.mxu1 %v1313_v59  ;;  %1527 = vmatprep.subr.mxu1 %v2607_v0  ;;  %v1627_v59 = vld [vmem:[#allocation6] sm:$0xff]  ;;  %v1816_v15 = vld [vmem:[#allocation6 + $0x130] sm:$0xff] }
 0x1d7   : > { %1528 = vmatpush1.msra.mxu1 %v1512_v60  ;;  %2209 = vmatprep.mubr.msk.f32.mxu1 %vm1141_vm9, %v1520_v58  ;;  %v1718_v58 = vld [vmem:[#allocation6 + $0x78] sm:$0xff] }
 0x1d8   : > { %1529 = vmatprep.subr.mxu1 %v2607_v0  ;;  %2297 = vmatprep.subr.mxu0 %v2607_v0 }
 0x1d9   : > { %1530 = vmatpush1.msra.mxu1 %v1511_v63  ;;  %2298 = vmatpush3.msra.mxu0 %v1639_v16  ;;  %v1717_v63 = vld [vmem:[#allocation6 + $0x70] sm:$0xff]  ;;  %v1906_v16 = vld [vmem:[#allocation6 + $0x1a8] sm:$0xff] }
 0x1da   : > { %1531 = vmatprep.subr.mxu1 %v2607_v0  ;;  %2299 = vmatprep.subr.mxu0 %v2607_v0 }
 0x1db   : > { %1532 = vmatpush1.msra.mxu1 %v1510_v55  ;;  %2300 = vmatpush3.msra.mxu0 %v1638_v20  ;;  %v1814_v20 = vld [vmem:[#allocation6 + $0x120] sm:$0xff] }
 0x1dc   : > { %1533 = vmatprep.subr.mxu1 %v2607_v0  ;;  %2301 = vmatprep.subr.mxu0 %v2607_v0 }
 0x1dd   : > { %1534 = vmatpush1.msra.mxu1 %v1509_v53  ;;  %2323 = vmatprep.mubr.msk.f32.mxu0 %vm2609_vm10, %v2607_v0 }
 0x1de   : > { %1535 = vmatprep.subr.mxu1 %v2607_v0 }
 0x1df   : > { %1536 = vmatpush1.msra.mxu1 %v1508_v1 }
 0x1e0   : > { %1537 = vmatprep.subr.mxu1 %v2607_v0 }
 0x1e1   : > { %1538 = vmatpush1.msra.mxu1 %v1507_v2 }
 0x1e2   : > { %1539 = vmatprep.subr.mxu1 %v2607_v0 }
 0x1e3   : > { %1540 = vmatpush1.msra.mxu1 %v1506_v3 }
 0x1e4   : > { %1541 = vmatprep.subr.mxu1 %v2607_v0 }
 0x1e5   : > { %1542 = vmatpush1.msra.mxu1 %v1505_v4 }
 0x1e6   : > { %1543 = vmatprep.subr.mxu1 %v2607_v0 }
 0x1e7   : > { %1544 = vmatpush1.msra.mxu1 %v1504_v5 }
 0x1e8   : > { %1545 = vmatprep.subr.mxu1 %v2607_v0 }
 0x1e9   : > { %1546 = vmatpush1.msra.mxu1 %v1503_v6 }
 0x1ea   : > { %1547 = vmatprep.subr.mxu1 %v2607_v0 }
 0x1eb   : > { %1548 = vmatpush1.msra.mxu1 %v1502_v7 }
 0x1ec   : > { %1549 = vmatprep.subr.mxu1 %v2607_v0 }
 0x1ed   : > { %1550 = vmatpush1.msra.mxu1 %v1501_v8 }
 0x1ee   : > { %1551 = vmatprep.subr.mxu1 %v2607_v0 }
 0x1ef   : > { %1552 = vmatpush1.msra.mxu1 %v1500_v9  ;;  %v1819_v9 = vld [vmem:[#allocation6 + $0x148] sm:$0xff] }
 0x1f0   : > { %1553 = vmatprep.subr.mxu1 %v2607_v0 }
 0x1f1   : > { %1554 = vmatpush1.msra.mxu1 %v1499_v10 }
 0x1f2   : > { %1555 = vmatprep.subr.mxu1 %v2607_v0 }
 0x1f3   : > { %1556 = vmatpush1.msra.mxu1 %v1498_v11  ;;  %v1818_v11 = vld [vmem:[#allocation6 + $0x140] sm:$0xff] }
 0x1f4   : > { %1557 = vmatprep.subr.mxu1 %v2607_v0 }
 0x1f5   : > { %1558 = vmatpush1.msra.mxu1 %v1497_v12  ;;  %v1908_v12 = vld [vmem:[#allocation6 + $0x1b8] sm:$0xff] }
 0x1f6   : > { %1587 = vmatprep.subr.mxu1 %v2607_v0 }
 0x1f7   : > { %2208 = vmatpush2.msk.msra.mxu1 %vm1050_vm6, %v1514_v13  ;;  %v1817_v13 = vld [vmem:[#allocation6 + $0x138] sm:$0xff] }
 0x1f8   : > { %1589 = vmatprep.subr.mxu1 %v2607_v0 }
 0x1f9   : > { %1590 = vmatpush2.msra.mxu1 %v1513_v14  ;;  %v1907_v14 = vld [vmem:[#allocation6 + $0x1b0] sm:$0xff] }
 0x1fa   : > { %1592 = vmatmul.mubr.f32.vlgmr.msra.gmra.mxu1 %v2928_v17  ;;  %2326 = vmatprep.subr.mxu1 %v2607_v0  ;;  %v1637_v17 = vld [vmem:[#allocation6 + $0x50] sm:$0xff] }
 0x1fb   : > { %2327 = vmatpush3.msra.mxu1 %v1730_v18  ;;  %2302 = vmatpush3.msra.mxu0 %v1637_v17  ;;  %v1815_v18 = vld [vmem:[#allocation6 + $0x128] sm:$0xff]  ;;  %v1813_v17 = vld [vmem:[#allocation6 + $0x118] sm:$0xff] }
 0x1fc   : > { %2328 = vmatprep.subr.mxu1 %v2607_v0  ;;  %2303 = vmatprep.subr.mxu0 %v2607_v0 }
 0x1fd   : > { %2329 = vmatpush3.msra.mxu1 %v1729_v19  ;;  %2304 = vmatpush3.msra.mxu0 %v1636_v23  ;;  %v1905_v19 = vld [vmem:[#allocation6 + $0x1a0] sm:$0xff]  ;;  %v1812_v23 = vld [vmem:[#allocation6 + $0x110] sm:$0xff] }
 0x1fe   : > { %2330 = vmatprep.subr.mxu1 %v2607_v0  ;;  %2305 = vmatprep.subr.mxu0 %v2607_v0 }
 0x1ff   : > { %2331 = vmatpush3.msra.mxu1 %v1728_v21  ;;  %2306 = vmatpush3.msra.mxu0 %v1635_v25  ;;  %v1904_v21 = vld [vmem:[#allocation6 + $0x198] sm:$0xff]  ;;  %v1811_v25 = vld [vmem:[#allocation6 + $0x108] sm:$0xff] }
 0x200   : > { %2332 = vmatprep.subr.mxu1 %v2607_v0  ;;  %2307 = vmatprep.subr.mxu0 %v2607_v0 }
 0x201   : > { %2333 = vmatpush3.msra.mxu1 %v1727_v22  ;;  %2308 = vmatpush3.msra.mxu0 %v1634_v27  ;;  %v1903_v22 = vld [vmem:[#allocation6 + $0x190] sm:$0xff]  ;;  %v1810_v27 = vld [vmem:[#allocation6 + $0x100] sm:$0xff] }
 0x202   : > { %2334 = vmatprep.subr.mxu1 %v2607_v0  ;;  %2309 = vmatprep.subr.mxu0 %v2607_v0 }
 0x203   : > { %2335 = vmatpush3.msra.mxu1 %v1726_v24  ;;  %2310 = vmatpush3.msra.mxu0 %v1633_v29  ;;  %v1902_v24 = vld [vmem:[#allocation6 + $0x188] sm:$0xff]  ;;  %v1809_v29 = vld [vmem:[#allocation6 + $0xf8] sm:$0xff] }
 0x204   : > { %2336 = vmatprep.subr.mxu1 %v2607_v0  ;;  %2311 = vmatprep.subr.mxu0 %v2607_v0 }
 0x205   : > { %2337 = vmatpush3.msra.mxu1 %v1725_v26  ;;  %2312 = vmatpush3.msra.mxu0 %v1632_v31  ;;  %v1901_v26 = vld [vmem:[#allocation6 + $0x180] sm:$0xff]  ;;  %v1808_v31 = vld [vmem:[#allocation6 + $0xf0] sm:$0xff] }
 0x206   : > { %2338 = vmatprep.subr.mxu1 %v2607_v0  ;;  %2313 = vmatprep.subr.mxu0 %v2607_v0 }
 0x207   : > { %2339 = vmatpush3.msra.mxu1 %v1724_v28  ;;  %2314 = vmatpush3.msra.mxu0 %v1631_v33  ;;  %v1900_v28 = vld [vmem:[#allocation6 + $0x178] sm:$0xff]  ;;  %v1807_v33 = vld [vmem:[#allocation6 + $0xe8] sm:$0xff] }
 0x208   : > { %2340 = vmatprep.subr.mxu1 %v2607_v0  ;;  %2315 = vmatprep.subr.mxu0 %v2607_v0 }
 0x209   : > { %2341 = vmatpush3.msra.mxu1 %v1723_v30  ;;  %2316 = vmatpush3.msra.mxu0 %v1630_v35  ;;  %v1899_v30 = vld [vmem:[#allocation6 + $0x170] sm:$0xff]  ;;  %v1806_v35 = vld [vmem:[#allocation6 + $0xe0] sm:$0xff] }
 0x20a   : > { %2342 = vmatprep.subr.mxu1 %v2607_v0  ;;  %2317 = vmatprep.subr.mxu0 %v2607_v0 }
 0x20b   : > { %2343 = vmatpush3.msra.mxu1 %v1722_v32  ;;  %2318 = vmatpush3.msra.mxu0 %v1629_v37  ;;  %v1898_v32 = vld [vmem:[#allocation6 + $0x168] sm:$0xff] }
 0x20c   : > { %2344 = vmatprep.subr.mxu1 %v2607_v0  ;;  %2319 = vmatprep.subr.mxu0 %v2607_v0 }
 0x20d   : > { %2345 = vmatpush3.msra.mxu1 %v1721_v34  ;;  %2320 = vmatpush3.msra.mxu0 %v1628_v39  ;;  %v1897_v34 = vld [vmem:[#allocation6 + $0x160] sm:$0xff] }
 0x20e   : > { %2346 = vmatprep.subr.mxu1 %v2607_v0  ;;  %2321 = vmatprep.subr.mxu0 %v2607_v0 }
 0x20f   : > { %2347 = vmatpush3.msra.mxu1 %v1720_v36  ;;  %2322 = vmatpush3.msra.mxu0 %v1627_v59  ;;  %v1896_v36 = vld [vmem:[#allocation6 + $0x158] sm:$0xff] }
 0x210   : > { %2348 = vmatprep.subr.mxu1 %v2607_v0  ;;  %2357 = vmatprep.subr.mxu0 %v2607_v0 }
 0x211   : > { %2349 = vmatpush3.msra.mxu1 %v1719_v38  ;;  %2354 = vmatprep.mubr.msk.f32.mxu1 %vm2609_vm10, %v2607_v0  ;;  %v1895_v38 = vld [vmem:[#allocation6 + $0x150] sm:$0xff] }
 0x212   : > { %2350 = vmatprep.subr.mxu1 %v2607_v0 }
 0x213   : > { %2351 = vmatpush3.msra.mxu1 %v1718_v58 }
 0x214   : > { %2352 = vmatprep.subr.mxu1 %v2607_v0 }
 0x215   : > { %2353 = vmatpush3.msra.mxu1 %v1717_v63 }
 0x216   : > { %2388 = vmatprep.subr.mxu1 %v2607_v0 }
 0x26e   : > { %v1288_v40 = vpop.f32.mrf.mxu0 }
 0x270   : > { %v1290_v41 = vpop.f32.mrf.mxu0 }
 0x271   : > { %v1998_v41 = vld [vmem:[%s3163_s7 + $0x70] sm:$0xff] }
 0x272   : > { %v1213_v42 = vpop.f32.mrf.mxu1 }
 0x273   : > { %v1289_v43 = vadd.f32 %v1288_v40, %v1213_v42  ;;  %v1999_v40 = vld [vmem:[%s3163_s7 + $0x78] sm:$0xff]  ;;  %v1997_v42 = vld [vmem:[%s3163_s7 + $0x68] sm:$0xff] }
 0x274   : > { %v1215_v44 = vpop.f32.mrf.mxu1 }
 0x275   : > { %v1995_v44 = vld [vmem:[%s3163_s7 + $0x58] sm:$0xff] }
 0x293   : > { %v1491_v45 = vpop.f32.mrf.mxu0 }
 0x295   : > { %v1493_v46 = vpop.f32.mrf.mxu0 }
 0x296   : > { %v1389_v47 = vpop.f32.mrf.mxu1  ;;  %v1993_v46 = vld [vmem:[%s3163_s7 + $0x48] sm:$0xff] }
 0x297   : > { %v1393_v49 = vadd.f32 %v1389_v47, %v1289_v43  ;;  %v1996_v43 = vld [vmem:[%s3163_s7 + $0x60] sm:$0xff] }
 0x298   : > { %v1391_v48 = vpop.f32.mrf.mxu1  ;;  %v1992_v47 = vld [vmem:[%s3163_s7 + $0x40] sm:$0xff] }
 0x299   : > { %v1495_v50 = vadd.f32 %v1491_v45, %v1393_v49  ;;  %v1994_v45 = vld [vmem:[%s3163_s7 + $0x50] sm:$0xff]  ;;  %v1991_v48 = vld [vmem:[%s3163_s7 + $0x38] sm:$0xff] }
 0x29a   : > { %v1990_v49 = vld [vmem:[%s3163_s7 + $0x30] sm:$0xff] }
 0x2ba   : > { %v1593_v51 = vpop.f32.mrf.mxu1 }
 0x2bb   : > { %v1597_v56 = vadd.f32 %v1593_v51, %v1495_v50  ;;  %v1989_v50 = vld [vmem:[%s3163_s7 + $0x28] sm:$0xff]  ;;  %v1988_v51 = vld [vmem:[%s3163_s7 + $0x20] sm:$0xff] }
 0x2bc   : > { %v1595_v57 = vpop.f32.mrf.mxu1 }
 0x2bd   : > { %v1605_v60 = vadd.f32 %v2210_v52, %v1597_v56  ;;  %v1987_v52 = vld [vmem:[%s3163_s7 + $0x18] sm:$0xff]  ;;  %v1986_v56 = vld [vmem:[%s3163_s7 + $0x10] sm:$0xff]  ;;  %v1985_v57 = vld [vmem:[%s3163_s7 + $0x8] sm:$0xff] }
 0x2bf   : > { %v1606_v61 = vmax.f32 %v1605_v60, 0.0  ;;  %v1984_v60 = vld [vmem:[%s3163_s7] sm:$0xff] }
 0x2c1   : > { %v1608_v55 = vrot.slane %v1606_v61, 1 }
 0x2c3   : > { %v1610_v53 = vmax.f32 %v1606_v61, %v1608_v55  ;;  %v1626_v55 = vld [vmem:[%s3162_s6] sm:$0x1] }
 0x2c5   : > { %v1612_v1 = vrot.slane %v1610_v53, 1  ;;  %v1614_v2 = vrot.slane %v1610_v53, 2  ;;  %v1616_v3 = vrot.slane %v1610_v53, 3 }
 0x2c7   : > { %v1618_v4 = vsel %vm1047_vm5, %v1610_v53, %v1612_v1 }
 0x2c8   : > { %v1619_v5 = vsel %vm1050_vm6, %v1618_v4, %v1614_v2 }
 0x2c9   : > { %v1620_v6 = vsel %vm1053_vm7, %v1619_v5, %v1616_v3 }
 0x2ca   : > { %1622 = vrot.lane.b32.xlu1 %v1620_v6, %s2610_s22 }
 0x33c   : > { %v1623_v7 = vpop.permute.xlu1 %1622 }
 0x33d   : > { %v3035_v8 = vmax.f32 %v1620_v6, %v1623_v7 }
 0x33f   : > { %v1731_v10 = vrot.slane %v3035_v8, 1  ;;  %2324 = vmatmul.mubr.msk.f32.vlgmr.msra.gmra.mxu0 %vm1641_vm11, %v3035_v8  ;;  %v1820_v37 = vrot.slane %v3035_v8, 2  ;;  %v1909_v39 = vrot.slane %v3035_v8, 3 }
 0x340   : > { %2358 = vmatpush3.msra.mxu0 %v1819_v9  ;;  %2385 = vmatprep.mubr.msk.f32.mxu0 %vm2609_vm10, %v2607_v0 }
 0x341   : > { %2359 = vmatprep.subr.mxu0 %v2607_v0  ;;  %2355 = vmatmul.mubr.msk.f32.vlgmr.msra.gmra.mxu1 %vm1641_vm11, %v1731_v10 }
 0x342   : > { %2360 = vmatpush3.msra.mxu0 %v1818_v11  ;;  %2389 = vmatpush3.msra.mxu1 %v1908_v12 }
 0x343   : > { %2361 = vmatprep.subr.mxu0 %v2607_v0  ;;  %2390 = vmatprep.subr.mxu1 %v2607_v0 }
 0x344   : > { %2362 = vmatpush3.msra.mxu0 %v1817_v13  ;;  %2391 = vmatpush3.msra.mxu1 %v1907_v14 }
 0x345   : > { %2363 = vmatprep.subr.mxu0 %v2607_v0  ;;  %2392 = vmatprep.subr.mxu1 %v2607_v0 }
 0x346   : > { %2364 = vmatpush3.msra.mxu0 %v1816_v15  ;;  %2393 = vmatpush3.msra.mxu1 %v1906_v16 }
 0x347   : > { %2365 = vmatprep.subr.mxu0 %v2607_v0  ;;  %2394 = vmatprep.subr.mxu1 %v2607_v0 }
 0x348   : > { %2366 = vmatpush3.msra.mxu0 %v1815_v18  ;;  %2395 = vmatpush3.msra.mxu1 %v1905_v19 }
 0x349   : > { %2367 = vmatprep.subr.mxu0 %v2607_v0  ;;  %2396 = vmatprep.subr.mxu1 %v2607_v0 }
 0x34a   : > { %2368 = vmatpush3.msra.mxu0 %v1814_v20  ;;  %2397 = vmatpush3.msra.mxu1 %v1904_v21 }
 0x34b   : > { %2369 = vmatprep.subr.mxu0 %v2607_v0  ;;  %2398 = vmatprep.subr.mxu1 %v2607_v0 }
 0x34c   : > { %2370 = vmatpush3.msra.mxu0 %v1813_v17  ;;  %2399 = vmatpush3.msra.mxu1 %v1903_v22 }
 0x34d   : > { %2371 = vmatprep.subr.mxu0 %v2607_v0  ;;  %2400 = vmatprep.subr.mxu1 %v2607_v0 }
 0x34e   : > { %2372 = vmatpush3.msra.mxu0 %v1812_v23  ;;  %2401 = vmatpush3.msra.mxu1 %v1902_v24 }
 0x34f   : > { %2373 = vmatprep.subr.mxu0 %v2607_v0  ;;  %2402 = vmatprep.subr.mxu1 %v2607_v0 }
 0x350   : > { %2374 = vmatpush3.msra.mxu0 %v1811_v25  ;;  %2403 = vmatpush3.msra.mxu1 %v1901_v26 }
 0x351   : > { %2375 = vmatprep.subr.mxu0 %v2607_v0  ;;  %2404 = vmatprep.subr.mxu1 %v2607_v0 }
 0x352   : > { %2376 = vmatpush3.msra.mxu0 %v1810_v27  ;;  %2405 = vmatpush3.msra.mxu1 %v1900_v28 }
 0x353   : > { %2377 = vmatprep.subr.mxu0 %v2607_v0  ;;  %2406 = vmatprep.subr.mxu1 %v2607_v0 }
 0x354   : > { %2378 = vmatpush3.msra.mxu0 %v1809_v29  ;;  %2407 = vmatpush3.msra.mxu1 %v1899_v30 }
 0x355   : > { %2379 = vmatprep.subr.mxu0 %v2607_v0  ;;  %2408 = vmatprep.subr.mxu1 %v2607_v0 }
 0x356   : > { %2380 = vmatpush3.msra.mxu0 %v1808_v31  ;;  %2409 = vmatpush3.msra.mxu1 %v1898_v32 }
 0x357   : > { %2381 = vmatprep.subr.mxu0 %v2607_v0  ;;  %2410 = vmatprep.subr.mxu1 %v2607_v0 }
 0x358   : > { %2382 = vmatpush3.msra.mxu0 %v1807_v33  ;;  %2411 = vmatpush3.msra.mxu1 %v1897_v34 }
 0x359   : > { %2383 = vmatprep.subr.mxu0 %v2607_v0  ;;  %2412 = vmatprep.subr.mxu1 %v2607_v0 }
 0x35a   : > { %2384 = vmatpush3.msra.mxu0 %v1806_v35  ;;  %2413 = vmatpush3.msra.mxu1 %v1896_v36 }
 0x35b   : > { %2386 = vmatmul.mubr.msk.f32.vlgmr.msra.gmra.mxu0 %vm1641_vm11, %v1820_v37  ;;  %2414 = vmatprep.subr.mxu1 %v2607_v0 }
 0x35c   : > { %2415 = vmatpush3.msra.mxu1 %v1895_v38  ;;  %2416 = vmatprep.mubr.msk.f32.mxu1 %vm2609_vm10, %v2607_v0 }
 0x35d   : > { %2417 = vmatmul.mubr.msk.f32.vlgmr.msra.gmra.mxu1 %vm1641_vm11, %v1909_v39  ;;  %2419 = vmatprep.subr.mxu0 %v2607_v0 }
 0x35e   : > { %2451 = vmatprep.mubr.msk.f32.mxu0 %vm2609_vm10, %v2607_v0  ;;  %2420 = vmatpush3.msra.mxu0 %v1999_v40 }
 0x35f   : > { %2421 = vmatprep.subr.mxu0 %v2607_v0 }
 0x360   : > { %2422 = vmatpush3.msra.mxu0 %v1998_v41 }
 0x361   : > { %2423 = vmatprep.subr.mxu0 %v2607_v0 }
 0x362   : > { %2424 = vmatpush3.msra.mxu0 %v1997_v42 }
 0x363   : > { %2425 = vmatprep.subr.mxu0 %v2607_v0 }
 0x364   : > { %2426 = vmatpush3.msra.mxu0 %v1996_v43 }
 0x365   : > { %2427 = vmatprep.subr.mxu0 %v2607_v0 }
 0x366   : > { %2428 = vmatpush3.msra.mxu0 %v1995_v44 }
 0x367   : > { %2429 = vmatprep.subr.mxu0 %v2607_v0 }
 0x368   : > { %2430 = vmatpush3.msra.mxu0 %v1994_v45 }
 0x369   : > { %2431 = vmatprep.subr.mxu0 %v2607_v0 }
 0x36a   : > { %2432 = vmatpush3.msra.mxu0 %v1993_v46 }
 0x36b   : > { %2433 = vmatprep.subr.mxu0 %v2607_v0 }
 0x36c   : > { %2434 = vmatpush3.msra.mxu0 %v1992_v47 }
 0x36d   : > { %2435 = vmatprep.subr.mxu0 %v2607_v0 }
 0x36e   : > { %2436 = vmatpush3.msra.mxu0 %v1991_v48 }
 0x36f   : > { %2437 = vmatprep.subr.mxu0 %v2607_v0 }
 0x370   : > { %2438 = vmatpush3.msra.mxu0 %v1990_v49 }
 0x371   : > { %2439 = vmatprep.subr.mxu0 %v2607_v0 }
 0x372   : > { %2440 = vmatpush3.msra.mxu0 %v1989_v50 }
 0x373   : > { %2441 = vmatprep.subr.mxu0 %v2607_v0 }
 0x374   : > { %2442 = vmatpush3.msra.mxu0 %v1988_v51 }
 0x375   : > { %2443 = vmatprep.subr.mxu0 %v2607_v0 }
 0x376   : > { %2444 = vmatpush3.msra.mxu0 %v1987_v52 }
 0x377   : > { %2445 = vmatprep.subr.mxu0 %v2607_v0 }
 0x378   : > { %2446 = vmatpush3.msra.mxu0 %v1986_v56 }
 0x379   : > { %2447 = vmatprep.subr.mxu0 %v2607_v0 }
 0x37a   : > { %2448 = vmatpush3.msra.mxu0 %v1985_v57 }
 0x37b   : > { %2449 = vmatprep.subr.mxu0 %v2607_v0  ;;  %v2000_v0 = vld [vmem:[%s3164_s8] sm:$0x1] }
 0x37c   : > { %2450 = vmatpush3.msra.mxu0 %v1984_v60 }
 0x3ff   : > { %v1711_v61 = vpop.f32.mrf.mxu0 }
 0x400   : > { %v1715_v53 = vadd.f32 %v1711_v61, %v1626_v55 }
 0x401   : > { %v2325_v59 = vpop.f32.mrf.mxu0  ;;  %v1800_v58 = vpop.f32.mrf.mxu1 }
 0x402   : > { %v1804_v1 = vadd.f32 %v1800_v58, %v1715_v53 }
 0x403   : > { %v2356_v63 = vpop.f32.mrf.mxu1 }
 0x41b   : > { %v1889_v2 = vpop.f32.mrf.mxu0 }
 0x41c   : > { %v1893_v3 = vadd.f32 %v1889_v2, %v1804_v1 }
 0x41d   : > { %v2387_v4 = vpop.f32.mrf.mxu0  ;;  %v1978_v5 = vpop.f32.mrf.mxu1 }
 0x41e   : > { %v1982_v6 = vadd.f32 %v1978_v5, %v1893_v3 }
 0x41f   : > { %v2418_v7 = vpop.f32.mrf.mxu1 }
 0x420   : > { %v1983_v8 = vmax.f32 %v1982_v6, 0.0 }
 0x422   : > { %2452 = vmatmul.mubr.f32.vlgmr.msra.gmra.mxu0 %v1983_v8 }
 0x4e2   : > { %v2067_v9 = vpop.f32.mrf.mxu0 }
 0x4e3   : > { %v2068_v10 = vadd.f32 %v2067_v9, %v2000_v0 }
 0x4e4   : > { %v2453_v11 = vpop.f32.mrf.mxu0 }
 0x4e5   : > { %v2071_v12 = vmax.f32 %v2068_v10, 0.0 }
 0x4e7   : > { %v2075_v13 = vrot.slane %v2071_v12, %v957_v62 }
 0x4e9   : > { %2076 = vst [vmem:[%s374_s24] sm:$0xff] %v2075_v13 }
 0x4ea PF: > { %s21_s30 = sadd.s32 1, %s2598_s30  }
 0x4eb   : > { %p18_p2 = scmp.ge.s32.totalorder %s21_s30, 4  }
 0x4ed   :  { %20 = sbr.rel (!%p18_p2) target bundleno = 2 (0x2), region = 110 }
 0x4f2   :  { %2096 = vsyncpa [#allocation3], 1 }
 0x4f3   :  { %2098 = vsyncpa [#allocation3 + $0x1], 1 }
 0x4f4   :  { %2099 = vsyncpa [#allocation5], 1 }

</bundles_post_ra>
